<compile_context>
chip_gen: v7x
topology: tpu7x:2x2x1
jax: 0.10.0
libtpu: 0.0.40
codegen_flags: <defaults>
</compile_context>

<pallas_src>
import jax
import jax.numpy as jnp
import numpy as np
from jax import lax
from jax.experimental import pallas as pl
from jax.experimental.pallas import tpu as pltpu


# ----------------------------- Pallas kernels -------------------------------

def _conv1_pool_kernel(xe_ref, xo_ref, m_ref, b_ref, o_ref):
    # xe_ref/xo_ref: (10, 20) f32 = even/odd rows of the zero-padded 20x20 image.
    # m_ref: (5, 20, 256) bf16 banded weights (one per vertical tap i); columns are laid out
    #        as [even output w | odd output w], each half = (w_out, cout) -> 8*16 = 128 lanes.
    # b_ref: (1, 128) f32 bias tiled over w_out.  o_ref: (8, 128) f32 = (Ho, Wo*Cout).
    acc_e = jnp.zeros((8, 256), jnp.float32)   # pre-pool output rows 0,2,...,14
    acc_o = jnp.zeros((8, 256), jnp.float32)   # pre-pool output rows 1,3,...,15
    for i in range(5):
        m_i = m_ref[i]                                     # (20, 256) bf16
        if i % 2 == 0:
            se = xe_ref[i // 2:i // 2 + 8, :]              # padded rows i, i+2, ...
            so = xo_ref[i // 2:i // 2 + 8, :]              # padded rows i+1, i+3, ...
        else:
            se = xo_ref[(i - 1) // 2:(i - 1) // 2 + 8, :]
            so = xe_ref[(i + 1) // 2:(i + 1) // 2 + 8, :]
        acc_e += jnp.dot(se.astype(jnp.bfloat16), m_i, preferred_element_type=jnp.float32)
        acc_o += jnp.dot(so.astype(jnp.bfloat16), m_i, preferred_element_type=jnp.float32)
    hmax = jnp.maximum(acc_e, acc_o)                       # 2x1 pool over H      -> (8, 256)
    wmax = jnp.maximum(hmax[:, :128], hmax[:, 128:])       # 1x2 pool over W      -> (8, 128)
    o_ref[...] = jnp.maximum(wmax + b_ref[...], 0.0)       # bias + ReLU (commutes with max)


def _conv2_pool_fc_kernel(ye_ref, yo_ref, m_ref, b_ref, wf_ref, bf_ref, o_ref):
    # ye_ref/yo_ref: (6, 192) f32 = even/odd rows of the padded (12, 12*16) layer-1 output.
    # m_ref: (5, 192, 256) bf16 banded conv2 weights.  b_ref: (1, 128) f32.
    # wf_ref: (4, 128, 128) bf16 FC weight (per pooled row h), output padded 10 -> 128 lanes.
    # bf_ref: (1, 128) f32.  o_ref: (1, 128) f32 (logits in lanes 0..9).
    acc_e = jnp.zeros((4, 256), jnp.float32)
    acc_o = jnp.zeros((4, 256), jnp.float32)
    for i in range(5):
        m_i = m_ref[i]                                     # (192, 256) bf16
        if i % 2 == 0:
            se = ye_ref[i // 2:i // 2 + 4, :]
            so = yo_ref[i // 2:i // 2 + 4, :]
        else:
            se = yo_ref[(i - 1) // 2:(i - 1) // 2 + 4, :]
            so = ye_ref[(i + 1) // 2:(i + 1) // 2 + 4, :]
        acc_e += jnp.dot(se.astype(jnp.bfloat16), m_i, preferred_element_type=jnp.float32)
        acc_o += jnp.dot(so.astype(jnp.bfloat16), m_i, preferred_element_type=jnp.float32)
    hmax = jnp.maximum(acc_e, acc_o)                       # (4, 256)
    wmax = jnp.maximum(hmax[:, :128], hmax[:, 128:])       # (4, 128) = (Ho=4, Wo=4 * Cout=32)
    act = jnp.maximum(wmax + b_ref[...], 0.0)              # fused bias + ReLU
    act_bf = act.astype(jnp.bfloat16)
    out = jnp.zeros((1, 128), jnp.float32)
    for h in range(4):                                     # fused FC: contract (h, w*32+c)
        out += jnp.dot(act_bf[h:h + 1, :], wf_ref[h], preferred_element_type=jnp.float32)
    o_ref[...] = out + bf_ref[...]


# --------------------------- Pallas call wrappers ----------------------------

def _conv1_pool(xe, xo, m1, b1t):
    B = xe.shape[0]
    return pl.pallas_call(
        _conv1_pool_kernel,
        out_shape=jax.ShapeDtypeStruct((B, 8, 128), jnp.float32),
        grid=(B,),
        in_specs=[
            pl.BlockSpec((None, 10, 20), lambda b: (b, 0, 0)),
            pl.BlockSpec((None, 10, 20), lambda b: (b, 0, 0)),
            pl.BlockSpec((5, 20, 256), lambda b: (0, 0, 0)),
            pl.BlockSpec((1, 128), lambda b: (0, 0)),
        ],
        out_specs=pl.BlockSpec((None, 8, 128), lambda b: (b, 0, 0)),
        compiler_params=pltpu.CompilerParams(dimension_semantics=("parallel",)),
    )(xe, xo, m1, b1t)


def _conv2_pool_fc(ye, yo, m2, b2t, wf3, bft):
    B = ye.shape[0]
    return pl.pallas_call(
        _conv2_pool_fc_kernel,
        out_shape=jax.ShapeDtypeStruct((B, 1, 128), jnp.float32),
        grid=(B,),
        in_specs=[
            pl.BlockSpec((None, 6, 192), lambda b: (b, 0, 0)),
            pl.BlockSpec((None, 6, 192), lambda b: (b, 0, 0)),
            pl.BlockSpec((5, 192, 256), lambda b: (0, 0, 0)),
            pl.BlockSpec((1, 128), lambda b: (0, 0)),
            pl.BlockSpec((4, 128, 128), lambda b: (0, 0, 0)),
            pl.BlockSpec((1, 128), lambda b: (0, 0)),
        ],
        out_specs=pl.BlockSpec((None, 1, 128), lambda b: (b, 0, 0)),
        compiler_params=pltpu.CompilerParams(dimension_semantics=("parallel",)),
    )(ye, yo, m2, b2t, wf3, bft)


# ------------------------- one-time weight preparation ------------------------

def _banded_conv_weights(w_oihw, padded_w):
    """Build per-vertical-tap banded matmul weights.

    Returns M of shape (KH, padded_w*Cin, Wpre*Cout) such that, for pre-pool output row h:
        out2d[h, col] = sum_i  xpad2d[h+i, :] @ M[i]
    with col = r*(Wo*Cout) + q*Cout + co  for output width index w = 2q + r (even/odd W
    packed into the two halves so the 2x2 W-pool becomes max(left_half, right_half)).
    """
    w = np.asarray(w_oihw, dtype=np.float32)               # (Cout, Cin, KH, KW)
    cout, cin, kh, kw = w.shape
    wpre = padded_w - (kw - 1)                             # pre-pool output width
    wo = wpre // 2
    m = np.zeros((kh, padded_w * cin, wpre * cout), np.float32)
    for i in range(kh):
        for j in range(kw):
            wt = w[:, :, i, j].T                           # (Cin, Cout)
            for wpos in range(wpre):
                q, r = wpos // 2, wpos % 2
                col0 = r * (wo * cout) + q * cout
                row0 = (wpos + j) * cin
                m[i, row0:row0 + cin, col0:col0 + cout] = wt
    return jnp.asarray(m)


def init_params(key):
    k = jax.random.split(key, 6)
    return {
        "w1": 0.1 * jax.random.normal(k[0], (16, 1, 5, 5), jnp.float32),    # OIHW
        "b1": 0.1 * jax.random.normal(k[1], (16,), jnp.float32),
        "w2": 0.05 * jax.random.normal(k[2], (32, 16, 5, 5), jnp.float32),  # OIHW
        "b2": 0.1 * jax.random.normal(k[3], (32,), jnp.float32),
        "wf": 0.05 * jax.random.normal(k[4], (10, 512), jnp.float32),       # over CHW flatten
        "bf": 0.1 * jax.random.normal(k[5], (10,), jnp.float32),
    }


def prepare_params(p):
    """Precompute all kernel-layout weights once (no per-forward transposes)."""
    m1 = _banded_conv_weights(p["w1"], padded_w=20).astype(jnp.bfloat16)    # (5, 20, 256)
    m2 = _banded_conv_weights(p["w2"], padded_w=12).astype(jnp.bfloat16)    # (5, 192, 256)
    b1t = jnp.tile(p["b1"], 8).reshape(1, 128).astype(jnp.float32)
    b2t = jnp.tile(p["b2"], 4).reshape(1, 128).astype(jnp.float32)
    # FC: PyTorch flattens (C,H,W); our layer-2 activation is (h, w*32+c).  Pad 10 -> 128 lanes.
    wf4 = np.asarray(p["wf"], dtype=np.float32).reshape(10, 32, 4, 4)       # (out, c, h, w)
    wf3 = np.zeros((4, 128, 128), np.float32)
    wf3[:, :, :10] = np.transpose(wf4, (2, 3, 1, 0)).reshape(4, 128, 10)    # (h, w*32+c, out)
    bft = np.zeros((1, 128), np.float32)
    bft[0, :10] = np.asarray(p["bf"], dtype=np.float32)
    return {
        "M1": m1, "b1t": b1t,
        "M2": m2, "b2t": b2t,
        "Wf3": jnp.asarray(wf3).astype(jnp.bfloat16), "bft": jnp.asarray(bft),
    }


# ------------------------------- forward pass --------------------------------

def cnn_forward(x_nchw, kp):
    """Pallas implementation of CNN.forward.  x_nchw: (B, 1, 16, 16) f32 -> (B, 10)."""
    B = x_nchw.shape[0]
    # layer 1 prep: pad and de-interleave rows (tiny XLA glue; the hot path is in-kernel).
    x = x_nchw[:, 0, :, :]                                          # (B, 16, 16)
    xp = jnp.pad(x, ((0, 0), (2, 2), (2, 2)))                       # (B, 20, 20)
    xe, xo = xp[:, 0::2, :], xp[:, 1::2, :]                         # (B, 10, 20) each
    y1 = _conv1_pool(xe, xo, kp["M1"], kp["b1t"])                   # (B, 8, 128) f32

    # layer 2 prep: reinterpret as NHWC, pad spatially, back to lane-dense (H, W*C).
    y1 = y1.reshape(B, 8, 8, 16)
    y1p = jnp.pad(y1, ((0, 0), (2, 2), (2, 2), (0, 0))).reshape(B, 12, 192)
    ye, yo = y1p[:, 0::2, :], y1p[:, 1::2, :]                       # (B, 6, 192) each
    out = _conv2_pool_fc(ye, yo, kp["M2"], kp["b2t"], kp["Wf3"], kp["bft"])  # (B, 1, 128)
    return out.reshape(B, 128)[:, :10]
    # TODO(synk): the zero-padding / row de-interleave between layers is plain XLA glue;
    # it could be folded into the kernels with VMEM scratch if launch count must shrink further.


def reference_forward(x, p):
    """Pure-JAX/XLA reference with PyTorch (NCHW) semantics (fp32)."""
    dn = ("NCHW", "OIHW", "NCHW")
    y = lax.conv_general_dilated(x, p["w1"], (1, 1), ((2, 2), (2, 2)), dimension_numbers=dn)
    y = jnp.maximum(y + p["b1"][None, :, None, None], 0.0)
    y = lax.reduce_window(y, -jnp.inf, lax.max, (1, 1, 2, 2), (1, 1, 2, 2), "VALID")
    y = lax.conv_general_dilated(y, p["w2"], (1, 1), ((2, 2), (2, 2)), dimension_numbers=dn)
    y = jnp.maximum(y + p["b2"][None, :, None, None], 0.0)
    y = lax.reduce_window(y, -jnp.inf, lax.max, (1, 1, 2, 2), (1, 1, 2, 2), "VALID")
    y = y.reshape(y.shape[0], -1)                                   # (B, 512), CHW order
    return y @ p["wf"].T + p["bf"]


if __name__ == "__main__":
    key = jax.random.PRNGKey(0)
    kx, kparam = jax.random.split(key)
    x = jax.random.normal(kx, (2, 1, 16, 16), jnp.float32)          # NCHW, like the PyTorch module
    params = init_params(kparam)
    kparams = prepare_params(params)

    fwd = jax.jit(cnn_forward)
    out = jax.block_until_ready(fwd(x, kparams))
    assert out.shape == (2, 10) and out.dtype == jnp.float32

    ref = jax.block_until_ready(jax.jit(reference_forward)(x, params))
    # bf16 matmul inputs with fp32 accumulation -> relax tolerance vs fp32 reference.
    if not jnp.allclose(out, ref, rtol=5e-2, atol=5e-2):
        err = float(jnp.max(jnp.abs(out - ref)))
        raise AssertionError(f"Pallas CNN output does not match JAX reference (max err {err})")

    print("KERNEL_OK")
</pallas_src>

<mosaic_0001>
module attributes {stable_mosaic.version = 11 : i64} {
  func.func @_conv1_pool_kernel(%arg0: i32, %arg1: memref<1x10x20xf32, #tpu.memory_space<vmem>>, %arg2: memref<1x10x20xf32, #tpu.memory_space<vmem>>, %arg3: memref<5x20x256xbf16, #tpu.memory_space<vmem>>, %arg4: memref<1x128xf32, #tpu.memory_space<vmem>>, %arg5: memref<1x8x128xf32, #tpu.memory_space<vmem>>) attributes {dimension_semantics = [#tpu.dimension_semantics<parallel>], iteration_bounds = array<i64: 2>, scalar_prefetch = 0 : i64, scratch_operands = 0 : i64, tpu.core_type = #tpu.core_type<tc>, window_params = [{transform_indices = @transform_0, window_bounds = array<i64: 1, 10, 20>}, {transform_indices = @transform_1, window_bounds = array<i64: 1, 10, 20>}, {pipeline_mode = #tpu.pipeline_mode<synchronous>, transform_indices = @transform_2, window_bounds = array<i64: 5, 20, 256>}, {pipeline_mode = #tpu.pipeline_mode<synchronous>, transform_indices = @transform_3, window_bounds = array<i64: 1, 128>}, {transform_indices = @transform_4, window_bounds = array<i64: 1, 8, 128>}]} {
    %cst = arith.constant 0.000000e+00 : f32
    %0 = vector.broadcast %cst : f32 to vector<8x256xf32>
    %cst_0 = arith.constant 0.000000e+00 : f32
    %1 = vector.broadcast %cst_0 : f32 to vector<8x256xf32>
    %c0 = arith.constant 0 : index
    %c0_1 = arith.constant 0 : index
    %c0_2 = arith.constant 0 : index
    %2 = vector.load %arg3[%c0, %c0_1, %c0_2] : memref<5x20x256xbf16, #tpu.memory_space<vmem>>, vector<1x20x256xbf16>
    %3 = vector.shape_cast %2 : vector<1x20x256xbf16> to vector<20x256xbf16>
    %c0_3 = arith.constant 0 : index
    %c0_4 = arith.constant 0 : index
    %c0_5 = arith.constant 0 : index
    %4 = vector.load %arg1[%c0_3, %c0_4, %c0_5] : memref<1x10x20xf32, #tpu.memory_space<vmem>>, vector<1x8x20xf32>
    %5 = vector.shape_cast %4 : vector<1x8x20xf32> to vector<8x20xf32>
    %c0_6 = arith.constant 0 : index
    %c0_7 = arith.constant 0 : index
    %c0_8 = arith.constant 0 : index
    %6 = vector.load %arg2[%c0_6, %c0_7, %c0_8] : memref<1x10x20xf32, #tpu.memory_space<vmem>>, vector<1x8x20xf32>
    %7 = vector.shape_cast %6 : vector<1x8x20xf32> to vector<8x20xf32>
    %8 = arith.truncf %5 : vector<8x20xf32> to vector<8x20xbf16>
    %cst_9 = arith.constant dense<0.000000e+00> : vector<8x256xf32>
    %9 = tpu.matmul %8, %3, %cst_9 {dimension_numbers = #tpu.dot_dimension_numbers<[1], [0], [0], [1], [0, 0, 1, 1], [], []>} : vector<8x20xbf16>, vector<20x256xbf16>, vector<8x256xf32> -> vector<8x256xf32>
    %10 = arith.addf %0, %9 : vector<8x256xf32>
    %11 = arith.truncf %7 : vector<8x20xf32> to vector<8x20xbf16>
    %cst_10 = arith.constant dense<0.000000e+00> : vector<8x256xf32>
    %12 = tpu.matmul %11, %3, %cst_10 {dimension_numbers = #tpu.dot_dimension_numbers<[1], [0], [0], [1], [0, 0, 1, 1], [], []>} : vector<8x20xbf16>, vector<20x256xbf16>, vector<8x256xf32> -> vector<8x256xf32>
    %13 = arith.addf %1, %12 : vector<8x256xf32>
    %c1 = arith.constant 1 : index
    %c0_11 = arith.constant 0 : index
    %c0_12 = arith.constant 0 : index
    %14 = vector.load %arg3[%c1, %c0_11, %c0_12] : memref<5x20x256xbf16, #tpu.memory_space<vmem>>, vector<1x20x256xbf16>
    %15 = vector.shape_cast %14 : vector<1x20x256xbf16> to vector<20x256xbf16>
    %c0_13 = arith.constant 0 : index
    %c0_14 = arith.constant 0 : index
    %c0_15 = arith.constant 0 : index
    %16 = vector.load %arg2[%c0_13, %c0_14, %c0_15] : memref<1x10x20xf32, #tpu.memory_space<vmem>>, vector<1x8x20xf32>
    %17 = vector.shape_cast %16 : vector<1x8x20xf32> to vector<8x20xf32>
    %c0_16 = arith.constant 0 : index
    %c1_17 = arith.constant 1 : index
    %c0_18 = arith.constant 0 : index
    %18 = vector.load %arg1[%c0_16, %c1_17, %c0_18] : memref<1x10x20xf32, #tpu.memory_space<vmem>>, vector<1x8x20xf32>
    %19 = vector.shape_cast %18 : vector<1x8x20xf32> to vector<8x20xf32>
    %20 = arith.truncf %17 : vector<8x20xf32> to vector<8x20xbf16>
    %cst_19 = arith.constant dense<0.000000e+00> : vector<8x256xf32>
    %21 = tpu.matmul %20, %15, %cst_19 {dimension_numbers = #tpu.dot_dimension_numbers<[1], [0], [0], [1], [0, 0, 1, 1], [], []>} : vector<8x20xbf16>, vector<20x256xbf16>, vector<8x256xf32> -> vector<8x256xf32>
    %22 = arith.addf %10, %21 : vector<8x256xf32>
    %23 = arith.truncf %19 : vector<8x20xf32> to vector<8x20xbf16>
    %cst_20 = arith.constant dense<0.000000e+00> : vector<8x256xf32>
    %24 = tpu.matmul %23, %15, %cst_20 {dimension_numbers = #tpu.dot_dimension_numbers<[1], [0], [0], [1], [0, 0, 1, 1], [], []>} : vector<8x20xbf16>, vector<20x256xbf16>, vector<8x256xf32> -> vector<8x256xf32>
    %25 = arith.addf %13, %24 : vector<8x256xf32>
    %c2 = arith.constant 2 : index
    %c0_21 = arith.constant 0 : index
    %c0_22 = arith.constant 0 : index
    %26 = vector.load %arg3[%c2, %c0_21, %c0_22] : memref<5x20x256xbf16, #tpu.memory_space<vmem>>, vector<1x20x256xbf16>
    %27 = vector.shape_cast %26 : vector<1x20x256xbf16> to vector<20x256xbf16>
    %c0_23 = arith.constant 0 : index
    %c1_24 = arith.constant 1 : index
    %c0_25 = arith.constant 0 : index
    %28 = vector.load %arg1[%c0_23, %c1_24, %c0_25] : memref<1x10x20xf32, #tpu.memory_space<vmem>>, vector<1x8x20xf32>
    %29 = vector.shape_cast %28 : vector<1x8x20xf32> to vector<8x20xf32>
    %c0_26 = arith.constant 0 : index
    %c1_27 = arith.constant 1 : index
    %c0_28 = arith.constant 0 : index
    %30 = vector.load %arg2[%c0_26, %c1_27, %c0_28] : memref<1x10x20xf32, #tpu.memory_space<vmem>>, vector<1x8x20xf32>
    %31 = vector.shape_cast %30 : vector<1x8x20xf32> to vector<8x20xf32>
    %32 = arith.truncf %29 : vector<8x20xf32> to vector<8x20xbf16>
    %cst_29 = arith.constant dense<0.000000e+00> : vector<8x256xf32>
    %33 = tpu.matmul %32, %27, %cst_29 {dimension_numbers = #tpu.dot_dimension_numbers<[1], [0], [0], [1], [0, 0, 1, 1], [], []>} : vector<8x20xbf16>, vector<20x256xbf16>, vector<8x256xf32> -> vector<8x256xf32>
    %34 = arith.addf %22, %33 : vector<8x256xf32>
    %35 = arith.truncf %31 : vector<8x20xf32> to vector<8x20xbf16>
    %cst_30 = arith.constant dense<0.000000e+00> : vector<8x256xf32>
    %36 = tpu.matmul %35, %27, %cst_30 {dimension_numbers = #tpu.dot_dimension_numbers<[1], [0], [0], [1], [0, 0, 1, 1], [], []>} : vector<8x20xbf16>, vector<20x256xbf16>, vector<8x256xf32> -> vector<8x256xf32>
    %37 = arith.addf %25, %36 : vector<8x256xf32>
    %c3 = arith.constant 3 : index
    %c0_31 = arith.constant 0 : index
    %c0_32 = arith.constant 0 : index
    %38 = vector.load %arg3[%c3, %c0_31, %c0_32] : memref<5x20x256xbf16, #tpu.memory_space<vmem>>, vector<1x20x256xbf16>
    %39 = vector.shape_cast %38 : vector<1x20x256xbf16> to vector<20x256xbf16>
    %c0_33 = arith.constant 0 : index
    %c1_34 = arith.constant 1 : index
    %c0_35 = arith.constant 0 : index
    %40 = vector.load %arg2[%c0_33, %c1_34, %c0_35] : memref<1x10x20xf32, #tpu.memory_space<vmem>>, vector<1x8x20xf32>
    %41 = vector.shape_cast %40 : vector<1x8x20xf32> to vector<8x20xf32>
    %c0_36 = arith.constant 0 : index
    %c2_37 = arith.constant 2 : index
    %c0_38 = arith.constant 0 : index
    %42 = vector.load %arg1[%c0_36, %c2_37, %c0_38] : memref<1x10x20xf32, #tpu.memory_space<vmem>>, vector<1x8x20xf32>
    %43 = vector.shape_cast %42 : vector<1x8x20xf32> to vector<8x20xf32>
    %44 = arith.truncf %41 : vector<8x20xf32> to vector<8x20xbf16>
    %cst_39 = arith.constant dense<0.000000e+00> : vector<8x256xf32>
    %45 = tpu.matmul %44, %39, %cst_39 {dimension_numbers = #tpu.dot_dimension_numbers<[1], [0], [0], [1], [0, 0, 1, 1], [], []>} : vector<8x20xbf16>, vector<20x256xbf16>, vector<8x256xf32> -> vector<8x256xf32>
    %46 = arith.addf %34, %45 : vector<8x256xf32>
    %47 = arith.truncf %43 : vector<8x20xf32> to vector<8x20xbf16>
    %cst_40 = arith.constant dense<0.000000e+00> : vector<8x256xf32>
    %48 = tpu.matmul %47, %39, %cst_40 {dimension_numbers = #tpu.dot_dimension_numbers<[1], [0], [0], [1], [0, 0, 1, 1], [], []>} : vector<8x20xbf16>, vector<20x256xbf16>, vector<8x256xf32> -> vector<8x256xf32>
    %49 = arith.addf %37, %48 : vector<8x256xf32>
    %c4 = arith.constant 4 : index
    %c0_41 = arith.constant 0 : index
    %c0_42 = arith.constant 0 : index
    %50 = vector.load %arg3[%c4, %c0_41, %c0_42] : memref<5x20x256xbf16, #tpu.memory_space<vmem>>, vector<1x20x256xbf16>
    %51 = vector.shape_cast %50 : vector<1x20x256xbf16> to vector<20x256xbf16>
    %c0_43 = arith.constant 0 : index
    %c2_44 = arith.constant 2 : index
    %c0_45 = arith.constant 0 : index
    %52 = vector.load %arg1[%c0_43, %c2_44, %c0_45] : memref<1x10x20xf32, #tpu.memory_space<vmem>>, vector<1x8x20xf32>
    %53 = vector.shape_cast %52 : vector<1x8x20xf32> to vector<8x20xf32>
    %c0_46 = arith.constant 0 : index
    %c2_47 = arith.constant 2 : index
    %c0_48 = arith.constant 0 : index
    %54 = vector.load %arg2[%c0_46, %c2_47, %c0_48] : memref<1x10x20xf32, #tpu.memory_space<vmem>>, vector<1x8x20xf32>
    %55 = vector.shape_cast %54 : vector<1x8x20xf32> to vector<8x20xf32>
    %56 = arith.truncf %53 : vector<8x20xf32> to vector<8x20xbf16>
    %cst_49 = arith.constant dense<0.000000e+00> : vector<8x256xf32>
    %57 = tpu.matmul %56, %51, %cst_49 {dimension_numbers = #tpu.dot_dimension_numbers<[1], [0], [0], [1], [0, 0, 1, 1], [], []>} : vector<8x20xbf16>, vector<20x256xbf16>, vector<8x256xf32> -> vector<8x256xf32>
    %58 = arith.addf %46, %57 : vector<8x256xf32>
    %59 = arith.truncf %55 : vector<8x20xf32> to vector<8x20xbf16>
    %cst_50 = arith.constant dense<0.000000e+00> : vector<8x256xf32>
    %60 = tpu.matmul %59, %51, %cst_50 {dimension_numbers = #tpu.dot_dimension_numbers<[1], [0], [0], [1], [0, 0, 1, 1], [], []>} : vector<8x20xbf16>, vector<20x256xbf16>, vector<8x256xf32> -> vector<8x256xf32>
    %61 = arith.addf %49, %60 : vector<8x256xf32>
    %62 = arith.maximumf %58, %61 : vector<8x256xf32>
    %63 = vector.extract_strided_slice %62 {offsets = [0, 0], sizes = [8, 128], strides = [1, 1]} : vector<8x256xf32> to vector<8x128xf32>
    %64 = vector.extract_strided_slice %62 {offsets = [0, 128], sizes = [8, 128], strides = [1, 1]} : vector<8x256xf32> to vector<8x128xf32>
    %65 = arith.maximumf %63, %64 : vector<8x128xf32>
    %c0_51 = arith.constant 0 : index
    %c0_52 = arith.constant 0 : index
    %66 = vector.load %arg4[%c0_51, %c0_52] : memref<1x128xf32, #tpu.memory_space<vmem>>, vector<1x128xf32>
    %67 = vector.broadcast %66 : vector<1x128xf32> to vector<8x128xf32>
    %68 = arith.addf %65, %67 : vector<8x128xf32>
    %cst_53 = arith.constant 0.000000e+00 : f32
    %69 = vector.broadcast %cst_53 : f32 to vector<8x128xf32>
    %70 = arith.maximumf %68, %69 : vector<8x128xf32>
    %c0_54 = arith.constant 0 : index
    %c0_55 = arith.constant 0 : index
    %c0_56 = arith.constant 0 : index
    %71 = vector.load %arg5[%c0_54, %c0_55, %c0_56] : memref<1x8x128xf32, #tpu.memory_space<vmem>>, vector<1x8x128xf32>
    %72 = vector.shape_cast %71 : vector<1x8x128xf32> to vector<8x128xf32>
    %73 = vector.shape_cast %70 : vector<8x128xf32> to vector<1x8x128xf32>
    tpu.vector_store %arg5[%c0_54, %c0_55, %c0_56], %73 {strides = array<i32>} : memref<1x8x128xf32, #tpu.memory_space<vmem>>, vector<1x8x128xf32>,
    return
  }
  func.func @transform_0(%arg0: i32) -> (i32, i32, i32) {
    %c0_i32 = arith.constant 0 : i32
    %c0_i32_0 = arith.constant 0 : i32
    %c0_i32_1 = arith.constant 0 : i32
    return %arg0, %c0_i32, %c0_i32_0 : i32, i32, i32
  }
  func.func @transform_1(%arg0: i32) -> (i32, i32, i32) {
    %c0_i32 = arith.constant 0 : i32
    %c0_i32_0 = arith.constant 0 : i32
    %c0_i32_1 = arith.constant 0 : i32
    return %arg0, %c0_i32, %c0_i32_0 : i32, i32, i32
  }
  func.func @transform_2(%arg0: i32) -> (i32, i32, i32) {
    %c0_i32 = arith.constant 0 : i32
    %c0_i32_0 = arith.constant 0 : i32
    %c0_i32_1 = arith.constant 0 : i32
    %c0_i32_2 = arith.constant 0 : i32
    return %c0_i32, %c0_i32_0, %c0_i32_1 : i32, i32, i32
  }
  func.func @transform_3(%arg0: i32) -> (i32, i32) {
    %c0_i32 = arith.constant 0 : i32
    %c0_i32_0 = arith.constant 0 : i32
    %c0_i32_1 = arith.constant 0 : i32
    return %c0_i32, %c0_i32_0 : i32, i32
  }
  func.func @transform_4(%arg0: i32) -> (i32, i32, i32) {
    %c0_i32 = arith.constant 0 : i32
    %c0_i32_0 = arith.constant 0 : i32
    %c0_i32_1 = arith.constant 0 : i32
    return %arg0, %c0_i32, %c0_i32_0 : i32, i32, i32
  }
}

module attributes {stable_mosaic.version = 11 : i64} {
  func.func @_conv2_pool_fc_kernel(%arg0: i32, %arg1: memref<1x6x192xf32, #tpu.memory_space<vmem>>, %arg2: memref<1x6x192xf32, #tpu.memory_space<vmem>>, %arg3: memref<5x192x256xbf16, #tpu.memory_space<vmem>>, %arg4: memref<1x128xf32, #tpu.memory_space<vmem>>, %arg5: memref<4x128x128xbf16, #tpu.memory_space<vmem>>, %arg6: memref<1x128xf32, #tpu.memory_space<vmem>>, %arg7: memref<1x1x128xf32, #tpu.memory_space<vmem>>) attributes {dimension_semantics = [#tpu.dimension_semantics<parallel>], iteration_bounds = array<i64: 2>, scalar_prefetch = 0 : i64, scratch_operands = 0 : i64, tpu.core_type = #tpu.core_type<tc>, window_params = [{transform_indices = @transform_0, window_bounds = array<i64: 1, 6, 192>}, {transform_indices = @transform_1, window_bounds = array<i64: 1, 6, 192>}, {pipeline_mode = #tpu.pipeline_mode<synchronous>, transform_indices = @transform_2, window_bounds = array<i64: 5, 192, 256>}, {pipeline_mode = #tpu.pipeline_mode<synchronous>, transform_indices = @transform_3, window_bounds = array<i64: 1, 128>}, {pipeline_mode = #tpu.pipeline_mode<synchronous>, transform_indices = @transform_4, window_bounds = array<i64: 4, 128, 128>}, {pipeline_mode = #tpu.pipeline_mode<synchronous>, transform_indices = @transform_5, window_bounds = array<i64: 1, 128>}, {transform_indices = @transform_6, window_bounds = array<i64: 1, 1, 128>}]} {
    %cst = arith.constant 0.000000e+00 : f32
    %0 = vector.broadcast %cst : f32 to vector<4x256xf32>
    %cst_0 = arith.constant 0.000000e+00 : f32
    %1 = vector.broadcast %cst_0 : f32 to vector<4x256xf32>
    %c0 = arith.constant 0 : index
    %c0_1 = arith.constant 0 : index
    %c0_2 = arith.constant 0 : index
    %2 = vector.load %arg3[%c0, %c0_1, %c0_2] : memref<5x192x256xbf16, #tpu.memory_space<vmem>>, vector<1x192x256xbf16>
    %3 = vector.shape_cast %2 : vector<1x192x256xbf16> to vector<192x256xbf16>
    %c0_3 = arith.constant 0 : index
    %c0_4 = arith.constant 0 : index
    %c0_5 = arith.constant 0 : index
    %4 = vector.load %arg1[%c0_3, %c0_4, %c0_5] : memref<1x6x192xf32, #tpu.memory_space<vmem>>, vector<1x4x192xf32>
    %5 = vector.shape_cast %4 : vector<1x4x192xf32> to vector<4x192xf32>
    %c0_6 = arith.constant 0 : index
    %c0_7 = arith.constant 0 : index
    %c0_8 = arith.constant 0 : index
    %6 = vector.load %arg2[%c0_6, %c0_7, %c0_8] : memref<1x6x192xf32, #tpu.memory_space<vmem>>, vector<1x4x192xf32>
    %7 = vector.shape_cast %6 : vector<1x4x192xf32> to vector<4x192xf32>
    %8 = arith.truncf %5 : vector<4x192xf32> to vector<4x192xbf16>
    %cst_9 = arith.constant dense<0.000000e+00> : vector<4x256xf32>
    %9 = tpu.matmul %8, %3, %cst_9 {dimension_numbers = #tpu.dot_dimension_numbers<[1], [0], [0], [1], [0, 0, 1, 1], [], []>} : vector<4x192xbf16>, vector<192x256xbf16>, vector<4x256xf32> -> vector<4x256xf32>
    %10 = arith.addf %0, %9 : vector<4x256xf32>
    %11 = arith.truncf %7 : vector<4x192xf32> to vector<4x192xbf16>
    %cst_10 = arith.constant dense<0.000000e+00> : vector<4x256xf32>
    %12 = tpu.matmul %11, %3, %cst_10 {dimension_numbers = #tpu.dot_dimension_numbers<[1], [0], [0], [1], [0, 0, 1, 1], [], []>} : vector<4x192xbf16>, vector<192x256xbf16>, vector<4x256xf32> -> vector<4x256xf32>
    %13 = arith.addf %1, %12 : vector<4x256xf32>
    %c1 = arith.constant 1 : index
    %c0_11 = arith.constant 0 : index
    %c0_12 = arith.constant 0 : index
    %14 = vector.load %arg3[%c1, %c0_11, %c0_12] : memref<5x192x256xbf16, #tpu.memory_space<vmem>>, vector<1x192x256xbf16>
    %15 = vector.shape_cast %14 : vector<1x192x256xbf16> to vector<192x256xbf16>
    %c0_13 = arith.constant 0 : index
    %c0_14 = arith.constant 0 : index
    %c0_15 = arith.constant 0 : index
    %16 = vector.load %arg2[%c0_13, %c0_14, %c0_15] : memref<1x6x192xf32, #tpu.memory_space<vmem>>, vector<1x4x192xf32>
    %17 = vector.shape_cast %16 : vector<1x4x192xf32> to vector<4x192xf32>
    %c0_16 = arith.constant 0 : index
    %c1_17 = arith.constant 1 : index
    %c0_18 = arith.constant 0 : index
    %18 = vector.load %arg1[%c0_16, %c1_17, %c0_18] : memref<1x6x192xf32, #tpu.memory_space<vmem>>, vector<1x4x192xf32>
    %19 = vector.shape_cast %18 : vector<1x4x192xf32> to vector<4x192xf32>
    %20 = arith.truncf %17 : vector<4x192xf32> to vector<4x192xbf16>
    %cst_19 = arith.constant dense<0.000000e+00> : vector<4x256xf32>
    %21 = tpu.matmul %20, %15, %cst_19 {dimension_numbers = #tpu.dot_dimension_numbers<[1], [0], [0], [1], [0, 0, 1, 1], [], []>} : vector<4x192xbf16>, vector<192x256xbf16>, vector<4x256xf32> -> vector<4x256xf32>
    %22 = arith.addf %10, %21 : vector<4x256xf32>
    %23 = arith.truncf %19 : vector<4x192xf32> to vector<4x192xbf16>
    %cst_20 = arith.constant dense<0.000000e+00> : vector<4x256xf32>
    %24 = tpu.matmul %23, %15, %cst_20 {dimension_numbers = #tpu.dot_dimension_numbers<[1], [0], [0], [1], [0, 0, 1, 1], [], []>} : vector<4x192xbf16>, vector<192x256xbf16>, vector<4x256xf32> -> vector<4x256xf32>
    %25 = arith.addf %13, %24 : vector<4x256xf32>
    %c2 = arith.constant 2 : index
    %c0_21 = arith.constant 0 : index
    %c0_22 = arith.constant 0 : index
    %26 = vector.load %arg3[%c2, %c0_21, %c0_22] : memref<5x192x256xbf16, #tpu.memory_space<vmem>>, vector<1x192x256xbf16>
    %27 = vector.shape_cast %26 : vector<1x192x256xbf16> to vector<192x256xbf16>
    %c0_23 = arith.constant 0 : index
    %c1_24 = arith.constant 1 : index
    %c0_25 = arith.constant 0 : index
    %28 = vector.load %arg1[%c0_23, %c1_24, %c0_25] : memref<1x6x192xf32, #tpu.memory_space<vmem>>, vector<1x4x192xf32>
    %29 = vector.shape_cast %28 : vector<1x4x192xf32> to vector<4x192xf32>
    %c0_26 = arith.constant 0 : index
    %c1_27 = arith.constant 1 : index
    %c0_28 = arith.constant 0 : index
    %30 = vector.load %arg2[%c0_26, %c1_27, %c0_28] : memref<1x6x192xf32, #tpu.memory_space<vmem>>, vector<1x4x192xf32>
    %31 = vector.shape_cast %30 : vector<1x4x192xf32> to vector<4x192xf32>
    %32 = arith.truncf %29 : vector<4x192xf32> to vector<4x192xbf16>
    %cst_29 = arith.constant dense<0.000000e+00> : vector<4x256xf32>
    %33 = tpu.matmul %32, %27, %cst_29 {dimension_numbers = #tpu.dot_dimension_numbers<[1], [0], [0], [1], [0, 0, 1, 1], [], []>} : vector<4x192xbf16>, vector<192x256xbf16>, vector<4x256xf32> -> vector<4x256xf32>
    %34 = arith.addf %22, %33 : vector<4x256xf32>
    %35 = arith.truncf %31 : vector<4x192xf32> to vector<4x192xbf16>
    %cst_30 = arith.constant dense<0.000000e+00> : vector<4x256xf32>
    %36 = tpu.matmul %35, %27, %cst_30 {dimension_numbers = #tpu.dot_dimension_numbers<[1], [0], [0], [1], [0, 0, 1, 1], [], []>} : vector<4x192xbf16>, vector<192x256xbf16>, vector<4x256xf32> -> vector<4x256xf32>
    %37 = arith.addf %25, %36 : vector<4x256xf32>
    %c3 = arith.constant 3 : index
    %c0_31 = arith.constant 0 : index
    %c0_32 = arith.constant 0 : index
    %38 = vector.load %arg3[%c3, %c0_31, %c0_32] : memref<5x192x256xbf16, #tpu.memory_space<vmem>>, vector<1x192x256xbf16>
    %39 = vector.shape_cast %38 : vector<1x192x256xbf16> to vector<192x256xbf16>
    %c0_33 = arith.constant 0 : index
    %c1_34 = arith.constant 1 : index
    %c0_35 = arith.constant 0 : index
    %40 = vector.load %arg2[%c0_33, %c1_34, %c0_35] : memref<1x6x192xf32, #tpu.memory_space<vmem>>, vector<1x4x192xf32>
    %41 = vector.shape_cast %40 : vector<1x4x192xf32> to vector<4x192xf32>
    %c0_36 = arith.constant 0 : index
    %c2_37 = arith.constant 2 : index
    %c0_38 = arith.constant 0 : index
    %42 = vector.load %arg1[%c0_36, %c2_37, %c0_38] : memref<1x6x192xf32, #tpu.memory_space<vmem>>, vector<1x4x192xf32>
    %43 = vector.shape_cast %42 : vector<1x4x192xf32> to vector<4x192xf32>
    %44 = arith.truncf %41 : vector<4x192xf32> to vector<4x192xbf16>
    %cst_39 = arith.constant dense<0.000000e+00> : vector<4x256xf32>
    %45 = tpu.matmul %44, %39, %cst_39 {dimension_numbers = #tpu.dot_dimension_numbers<[1], [0], [0], [1], [0, 0, 1, 1], [], []>} : vector<4x192xbf16>, vector<192x256xbf16>, vector<4x256xf32> -> vector<4x256xf32>
    %46 = arith.addf %34, %45 : vector<4x256xf32>
    %47 = arith.truncf %43 : vector<4x192xf32> to vector<4x192xbf16>
    %cst_40 = arith.constant dense<0.000000e+00> : vector<4x256xf32>
    %48 = tpu.matmul %47, %39, %cst_40 {dimension_numbers = #tpu.dot_dimension_numbers<[1], [0], [0], [1], [0, 0, 1, 1], [], []>} : vector<4x192xbf16>, vector<192x256xbf16>, vector<4x256xf32> -> vector<4x256xf32>
    %49 = arith.addf %37, %48 : vector<4x256xf32>
    %c4 = arith.constant 4 : index
    %c0_41 = arith.constant 0 : index
    %c0_42 = arith.constant 0 : index
    %50 = vector.load %arg3[%c4, %c0_41, %c0_42] : memref<5x192x256xbf16, #tpu.memory_space<vmem>>, vector<1x192x256xbf16>
    %51 = vector.shape_cast %50 : vector<1x192x256xbf16> to vector<192x256xbf16>
    %c0_43 = arith.constant 0 : index
    %c2_44 = arith.constant 2 : index
    %c0_45 = arith.constant 0 : index
    %52 = vector.load %arg1[%c0_43, %c2_44, %c0_45] : memref<1x6x192xf32, #tpu.memory_space<vmem>>, vector<1x4x192xf32>
    %53 = vector.shape_cast %52 : vector<1x4x192xf32> to vector<4x192xf32>
    %c0_46 = arith.constant 0 : index
    %c2_47 = arith.constant 2 : index
    %c0_48 = arith.constant 0 : index
    %54 = vector.load %arg2[%c0_46, %c2_47, %c0_48] : memref<1x6x192xf32, #tpu.memory_space<vmem>>, vector<1x4x192xf32>
    %55 = vector.shape_cast %54 : vector<1x4x192xf32> to vector<4x192xf32>
    %56 = arith.truncf %53 : vector<4x192xf32> to vector<4x192xbf16>
    %cst_49 = arith.constant dense<0.000000e+00> : vector<4x256xf32>
    %57 = tpu.matmul %56, %51, %cst_49 {dimension_numbers = #tpu.dot_dimension_numbers<[1], [0], [0], [1], [0, 0, 1, 1], [], []>} : vector<4x192xbf16>, vector<192x256xbf16>, vector<4x256xf32> -> vector<4x256xf32>
    %58 = arith.addf %46, %57 : vector<4x256xf32>
    %59 = arith.truncf %55 : vector<4x192xf32> to vector<4x192xbf16>
    %cst_50 = arith.constant dense<0.000000e+00> : vector<4x256xf32>
    %60 = tpu.matmul %59, %51, %cst_50 {dimension_numbers = #tpu.dot_dimension_numbers<[1], [0], [0], [1], [0, 0, 1, 1], [], []>} : vector<4x192xbf16>, vector<192x256xbf16>, vector<4x256xf32> -> vector<4x256xf32>
    %61 = arith.addf %49, %60 : vector<4x256xf32>
    %62 = arith.maximumf %58, %61 : vector<4x256xf32>
    %63 = vector.extract_strided_slice %62 {offsets = [0, 0], sizes = [4, 128], strides = [1, 1]} : vector<4x256xf32> to vector<4x128xf32>
    %64 = vector.extract_strided_slice %62 {offsets = [0, 128], sizes = [4, 128], strides = [1, 1]} : vector<4x256xf32> to vector<4x128xf32>
    %65 = arith.maximumf %63, %64 : vector<4x128xf32>
    %c0_51 = arith.constant 0 : index
    %c0_52 = arith.constant 0 : index
    %66 = vector.load %arg4[%c0_51, %c0_52] : memref<1x128xf32, #tpu.memory_space<vmem>>, vector<1x128xf32>
    %67 = vector.broadcast %66 : vector<1x128xf32> to vector<4x128xf32>
    %68 = arith.addf %65, %67 : vector<4x128xf32>
    %cst_53 = arith.constant 0.000000e+00 : f32
    %69 = vector.broadcast %cst_53 : f32 to vector<4x128xf32>
    %70 = arith.maximumf %68, %69 : vector<4x128xf32>
    %71 = arith.truncf %70 : vector<4x128xf32> to vector<4x128xbf16>
    %cst_54 = arith.constant 0.000000e+00 : f32
    %72 = vector.broadcast %cst_54 : f32 to vector<1x128xf32>
    %73 = vector.extract_strided_slice %71 {offsets = [0, 0], sizes = [1, 128], strides = [1, 1]} : vector<4x128xbf16> to vector<1x128xbf16>
    %c0_55 = arith.constant 0 : index
    %c0_56 = arith.constant 0 : index
    %c0_57 = arith.constant 0 : index
    %74 = vector.load %arg5[%c0_55, %c0_56, %c0_57] : memref<4x128x128xbf16, #tpu.memory_space<vmem>>, vector<1x128x128xbf16>
    %75 = vector.shape_cast %74 : vector<1x128x128xbf16> to vector<128x128xbf16>
    %cst_58 = arith.constant dense<0.000000e+00> : vector<1x128xf32>
    %76 = tpu.matmul %73, %75, %cst_58 {dimension_numbers = #tpu.dot_dimension_numbers<[1], [0], [0], [1], [0, 0, 1, 1], [], []>} : vector<1x128xbf16>, vector<128x128xbf16>, vector<1x128xf32> -> vector<1x128xf32>
    %77 = arith.addf %72, %76 : vector<1x128xf32>
    %78 = vector.extract_strided_slice %71 {offsets = [1, 0], sizes = [1, 128], strides = [1, 1]} : vector<4x128xbf16> to vector<1x128xbf16>
    %c1_59 = arith.constant 1 : index
    %c0_60 = arith.constant 0 : index
    %c0_61 = arith.constant 0 : index
    %79 = vector.load %arg5[%c1_59, %c0_60, %c0_61] : memref<4x128x128xbf16, #tpu.memory_space<vmem>>, vector<1x128x128xbf16>
    %80 = vector.shape_cast %79 : vector<1x128x128xbf16> to vector<128x128xbf16>
    %cst_62 = arith.constant dense<0.000000e+00> : vector<1x128xf32>
    %81 = tpu.matmul %78, %80, %cst_62 {dimension_numbers = #tpu.dot_dimension_numbers<[1], [0], [0], [1], [0, 0, 1, 1], [], []>} : vector<1x128xbf16>, vector<128x128xbf16>, vector<1x128xf32> -> vector<1x128xf32>
    %82 = arith.addf %77, %81 : vector<1x128xf32>
    %83 = vector.extract_strided_slice %71 {offsets = [2, 0], sizes = [1, 128], strides = [1, 1]} : vector<4x128xbf16> to vector<1x128xbf16>
    %c2_63 = arith.constant 2 : index
    %c0_64 = arith.constant 0 : index
    %c0_65 = arith.constant 0 : index
    %84 = vector.load %arg5[%c2_63, %c0_64, %c0_65] : memref<4x128x128xbf16, #tpu.memory_space<vmem>>, vector<1x128x128xbf16>
    %85 = vector.shape_cast %84 : vector<1x128x128xbf16> to vector<128x128xbf16>
    %cst_66 = arith.constant dense<0.000000e+00> : vector<1x128xf32>
    %86 = tpu.matmul %83, %85, %cst_66 {dimension_numbers = #tpu.dot_dimension_numbers<[1], [0], [0], [1], [0, 0, 1, 1], [], []>} : vector<1x128xbf16>, vector<128x128xbf16>, vector<1x128xf32> -> vector<1x128xf32>
    %87 = arith.addf %82, %86 : vector<1x128xf32>
    %88 = vector.extract_strided_slice %71 {offsets = [3, 0], sizes = [1, 128], strides = [1, 1]} : vector<4x128xbf16> to vector<1x128xbf16>
    %c3_67 = arith.constant 3 : index
    %c0_68 = arith.constant 0 : index
    %c0_69 = arith.constant 0 : index
    %89 = vector.load %arg5[%c3_67, %c0_68, %c0_69] : memref<4x128x128xbf16, #tpu.memory_space<vmem>>, vector<1x128x128xbf16>
    %90 = vector.shape_cast %89 : vector<1x128x128xbf16> to vector<128x128xbf16>
    %cst_70 = arith.constant dense<0.000000e+00> : vector<1x128xf32>
    %91 = tpu.matmul %88, %90, %cst_70 {dimension_numbers = #tpu.dot_dimension_numbers<[1], [0], [0], [1], [0, 0, 1, 1], [], []>} : vector<1x128xbf16>, vector<128x128xbf16>, vector<1x128xf32> -> vector<1x128xf32>
    %92 = arith.addf %87, %91 : vector<1x128xf32>
    %c0_71 = arith.constant 0 : index
    %c0_72 = arith.constant 0 : index
    %93 = vector.load %arg6[%c0_71, %c0_72] : memref<1x128xf32, #tpu.memory_space<vmem>>, vector<1x128xf32>
    %94 = arith.addf %92, %93 : vector<1x128xf32>
    %c0_73 = arith.constant 0 : index
    %c0_74 = arith.constant 0 : index
    %c0_75 = arith.constant 0 : index
    %95 = vector.load %arg7[%c0_73, %c0_74, %c0_75] : memref<1x1x128xf32, #tpu.memory_space<vmem>>, vector<1x1x128xf32>
    %96 = vector.shape_cast %95 : vector<1x1x128xf32> to vector<1x128xf32>
    %97 = vector.shape_cast %94 : vector<1x128xf32> to vector<1x1x128xf32>
    tpu.vector_store %arg7[%c0_73, %c0_74, %c0_75], %97 {strides = array<i32>} : memref<1x1x128xf32, #tpu.memory_space<vmem>>, vector<1x1x128xf32>,
    return
  }
  func.func @transform_0(%arg0: i32) -> (i32, i32, i32) {
    %c0_i32 = arith.constant 0 : i32
    %c0_i32_0 = arith.constant 0 : i32
    %c0_i32_1 = arith.constant 0 : i32
    return %arg0, %c0_i32, %c0_i32_0 : i32, i32, i32
  }
  func.func @transform_1(%arg0: i32) -> (i32, i32, i32) {
    %c0_i32 = arith.constant 0 : i32
    %c0_i32_0 = arith.constant 0 : i32
    %c0_i32_1 = arith.constant 0 : i32
    return %arg0, %c0_i32, %c0_i32_0 : i32, i32, i32
  }
  func.func @transform_2(%arg0: i32) -> (i32, i32, i32) {
    %c0_i32 = arith.constant 0 : i32
    %c0_i32_0 = arith.constant 0 : i32
    %c0_i32_1 = arith.constant 0 : i32
    %c0_i32_2 = arith.constant 0 : i32
    return %c0_i32, %c0_i32_0, %c0_i32_1 : i32, i32, i32
  }
  func.func @transform_3(%arg0: i32) -> (i32, i32) {
    %c0_i32 = arith.constant 0 : i32
    %c0_i32_0 = arith.constant 0 : i32
    %c0_i32_1 = arith.constant 0 : i32
    return %c0_i32, %c0_i32_0 : i32, i32
  }
  func.func @transform_4(%arg0: i32) -> (i32, i32, i32) {
    %c0_i32 = arith.constant 0 : i32
    %c0_i32_0 = arith.constant 0 : i32
    %c0_i32_1 = arith.constant 0 : i32
    %c0_i32_2 = arith.constant 0 : i32
    return %c0_i32, %c0_i32_0, %c0_i32_1 : i32, i32, i32
  }
  func.func @transform_5(%arg0: i32) -> (i32, i32) {
    %c0_i32 = arith.constant 0 : i32
    %c0_i32_0 = arith.constant 0 : i32
    %c0_i32_1 = arith.constant 0 : i32
    return %c0_i32, %c0_i32_0 : i32, i32
  }
  func.func @transform_6(%arg0: i32) -> (i32, i32, i32) {
    %c0_i32 = arith.constant 0 : i32
    %c0_i32_0 = arith.constant 0 : i32
    %c0_i32_1 = arith.constant 0 : i32
    return %arg0, %c0_i32, %c0_i32_0 : i32, i32, i32
  }
}

</mosaic_0001>

<bundles_post_ra>
// kernel: cnn_forward.2
= control target key start
LH: loop header
LB: loop body
LE: loop exit
PB: predicated region body
PF: predicated region fallthrough
CT: control target
= control target key end

     0   :  { %s1040_s15 = smov 0   ;;  %s1157_s0 = inlined_call_operand.vmem [shape: f32[2,10,20], index: 0, kind: input, shape index: {}]   ;;  %s1158_s1 = inlined_call_operand.vmem [shape: f32[2,10,20], index: 1, kind: input, shape index: {}]   ;;  %s1159_s2 = inlined_call_operand.vmem [shape: bf16[5,20,256], index: 2, kind: input, shape index: {}]   ;;  %s1160_s3 = inlined_call_operand.vmem [shape: f32[1,128], index: 3, kind: input, shape index: {}]   ;;  %s1161_s4 = inlined_call_operand.vmem [shape: f32[2,8,128], index: 4, kind: output, shape index: {}]  }
   0x1 LB: > { %s873_s16 = sadd.s32 4294967295, %s1012_s15   ;;  %p877_p0 = scmp.ge.s32.totalorder %s1012_s15, 1  ;;  %s1012_s15 = sphi %s1040_s15, %s14_s15  }
   0x2   : > { %p172_p1 = scmp.lt.s32.totalorder %s1012_s15, 3 }
   0x4   : > { %p173_p2 = pnand %p877_p0, %p172_p1 }
   0x5   : > { %v981_v0 = vld [vmem:[%s1159_s2 + $0x1c] ss:$8 sps:$4 sm:$0xff] (!%p173_p2)   ;;  %v983_v1 = vld [vmem:[%s1159_s2 + $0x18] ss:$8 sps:$4 sm:$0xff] (!%p173_p2)   ;;  %v885_v2 = vld [vmem:[%s1159_s2 + $0x28] sm:$0x33] (!%p173_p2) }
   0x6   : > { %176 = sbr.rel (%p173_p2) target bundleno = 290 (0x122), region = 36  ;;  %vm248_vm0 = vcmask (!%p173_p2), 1041408   ;;  %v1014_v3 = vmov (!%p173_p2), 0   ;;  %p202_p3 = scmp.lt.s32.totalorder (!%p173_p2), %s873_s16, 1  ;;  %255 = vmatprep.subr.bf16.mxu0 (!%p173_p2), %v981_v0  ;;  %365 = vmatprep.subr.bf16.mxu1 (!%p173_p2), %v981_v0  ;;  %v889_v4 = vcombine.high (!%p173_p2), %v885_v2, %v885_v2  ;;  %v888_v5 = vcombine.low (!%p173_p2), %v885_v2, %v885_v2  ;;  %v988_v7 = vld [vmem:[%s1159_s2 + $0x4] ss:$8 sps:$4 sm:$0xff] (!%p173_p2)  }
   0x7   : > { %287 = vmatprep.mubr.bf16.mxu0 (!%p173_p2), %v1014_v3  ;;  %397 = vmatprep.mubr.bf16.mxu1 (!%p173_p2), %v1014_v3  ;;  %v219_v8 = vld [vmem:[%s1159_s2 + $0x10] sm:$0x33] (!%p173_p2)  ;;  %vm244_vm1 = vcmask (!%p173_p2), 162816   ;;  %v986_v10 = vld [vmem:[%s1159_s2] ss:$8 sps:$4 sm:$0xff] (!%p173_p2)  }
   0x8   : > { %256 = vmatpush1.bf16.msra.mxu0 (!%p173_p2), %v983_v1  ;;  %366 = vmatpush1.bf16.msra.mxu1 (!%p173_p2), %v983_v1  ;;  %v250_v6 = vsel (!%p173_p2), %vm248_vm0, %v888_v5, 0  ;;  %v895_v12 = vcombine.high (!%p173_p2), %v219_v8, %v219_v8  ;;  %v894_v15 = vcombine.low (!%p173_p2), %v219_v8, %v219_v8  ;;  %v993_v17 = vld [vmem:[%s1159_s2 + $0x34] ss:$8 sps:$4 sm:$0xff] (!%p173_p2)   ;;  %v904_v19 = vld [vmem:[%s1159_s2 + $0x40] sm:$0x33] (!%p173_p2) }
   0x9   : > { %890 = vmatprep.subr.msk.bf16.mxu0 (!%p173_p2), %vm248_vm0, %v889_v4  ;;  %898 = vmatprep.subr.msk.bf16.mxu1 (!%p173_p2), %vm248_vm0, %v889_v4  ;;  %v991_v21 = vld [vmem:[%s1159_s2 + $0x30] ss:$8 sps:$4 sm:$0xff] (!%p173_p2)   ;;  %v908_v22 = vcombine.high (!%p173_p2), %v904_v19, %v904_v19  ;;  %v907_v23 = vcombine.low (!%p173_p2), %v904_v19, %v904_v19  ;;  %v998_v25 = vld [vmem:[%s1159_s2 + $0x4c] ss:$8 sps:$4 sm:$0xff] (!%p173_p2)   ;;  %v1001_v37 = vld [vmem:[%s1159_s2 + $0x60] ss:$8 sps:$4 sm:$0xff] (!%p173_p2)  }
   0xa   : > { %v315_v16 = vsel (!%p173_p2), %vm248_vm0, %v894_v15, 0  ;;  %v915_v27 = vld [vmem:[%s1159_s2 + $0x58] sm:$0x33] (!%p173_p2)  ;;  %v996_v29 = vld [vmem:[%s1159_s2 + $0x48] ss:$8 sps:$4 sm:$0xff] (!%p173_p2)  }
   0xb   : > { %v468_v24 = vsel (!%p173_p2), %vm248_vm0, %v907_v23, 0  ;;  %v919_v30 = vcombine.high (!%p173_p2), %v915_v27, %v915_v27  ;;  %v918_v31 = vcombine.low (!%p173_p2), %v915_v27, %v915_v27  ;;  %v1003_v33 = vld [vmem:[%s1159_s2 + $0x64] ss:$8 sps:$4 sm:$0xff] (!%p173_p2)   ;;  %v926_v35 = vld [vmem:[%s1159_s2 + $0x70] sm:$0x33] (!%p173_p2) }
   0xc   : > { %258 = vmatpush1.bf16.msra.mxu0 (!%p173_p2), %v250_v6  ;;  %368 = vmatpush1.bf16.msra.mxu1 (!%p173_p2), %v250_v6  ;;  %v930_v38 = vcombine.high (!%p173_p2), %v926_v35, %v926_v35  ;;  %v929_v39 = vcombine.low (!%p173_p2), %v926_v35, %v926_v35  ;;  %v935_v51 = vld [vmem:[%s1160_s3] ss:$0 sm:$0xff] (!%p173_p2) }
   0xd   : > { %s1163_s16 = smov (!%p202_p3, %s873_s16), 1  ;;  %320 = vmatprep.subr.bf16.mxu0 %v988_v7  ;;  %406 = vmatprep.subr.bf16.mxu1 %v988_v7  ;;  %v584_v32 = vsel %vm248_vm0, %v918_v31, 0 }
   0xe   : > { %s938_s27 = sshll.u32 %s1163_s16, 4  ;;  %v700_v40 = vsel %vm248_vm0, %v929_v39, 0 }
   0xf   : > { %s1074_s30 = scalar_lea.vmem %s1158_s1, %s938_s27  ;;  %s1079_s7 = scalar_lea.vmem %s1157_s0, %s938_s27 }
  0x10   : > { %v221_v9 = vld [vmem:[%s1074_s30] sm:$0xff] }
  0x11   : > { %v228_v11 = vld [vmem:[%s1079_s7 + $0x1] sm:$0xff]  ;;  %v223_v13 = vpack.c.bf16 %v221_v9, %v221_v9 }
  0x12   : > { %v361_v14 = vpack.c.bf16 %v228_v11, %v228_v11  ;;  %v220_v18 = vld [vmem:[%s1079_s7] sm:$0xff] }
  0x13   : > { %891 = vmatmul.mubr.msk.bf16.vlgmr.msra.gmra.mrb[0].mxu0 %vm244_vm1, %v223_v13  ;;  %v222_v20 = vpack.c.bf16 %v220_v18, %v220_v18  ;;  %v451_v26 = vld [vmem:[%s1074_s30 + $0x1] sm:$0xff] }
  0x14   : > { %899 = vmatmul.mubr.msk.bf16.vlgmr.msra.gmra.mrb[0].mxu1 %vm244_vm1, %v361_v14  ;;  %321 = vmatpush1.bf16.msra.mxu0 %v986_v10  ;;  %v516_v28 = vpack.c.bf16 %v451_v26, %v451_v26  ;;  %v567_v34 = vld [vmem:[%s1079_s7 + $0x2] sm:$0xff] }
  0x15   : > { %407 = vmatpush1.bf16.msra.mxu1 %v986_v10  ;;  %896 = vmatprep.subr.msk.bf16.mxu0 %vm248_vm0, %v895_v12  ;;  %v632_v36 = vpack.c.bf16 %v567_v34, %v567_v34  ;;  %v683_v41 = vld [vmem:[%s1074_s30 + $0x2] sm:$0xff]  ;;  %s882_s30 = sshll.u32 %s1163_s16, 3 }
  0x16   : > { %900 = vmatprep.subr.msk.bf16.mxu1 %vm248_vm0, %v895_v12  ;;  %352 = vmatprep.mubr.bf16.mxu0 %v1014_v3  ;;  %v748_v42 = vpack.c.bf16 %v683_v41, %v683_v41  ;;  %s215_s9 = scalar_lea.vmem %s1161_s4, %s882_s30 }
  0x17   : > { %438 = vmatprep.mubr.bf16.mxu1 %v1014_v3 }
  0x18   : > { %323 = vmatpush1.bf16.msra.mxu0 %v315_v16 }
  0x19   : > { %409 = vmatpush1.bf16.msra.mxu1 %v315_v16  ;;  %473 = vmatprep.subr.bf16.mxu0 %v993_v17 }
  0x1a   : > { %520 = vmatprep.subr.bf16.mxu1 %v993_v17 }
  0x1f   : > { %897 = vmatmul.mubr.msk.bf16.vlgmr.msra.gmra.mrb[0].mxu0 %vm244_vm1, %v222_v20 }
  0x20   : > { %901 = vmatmul.mubr.msk.bf16.vlgmr.msra.gmra.mrb[0].mxu1 %vm244_vm1, %v223_v13  ;;  %474 = vmatpush1.bf16.msra.mxu0 %v991_v21 }
  0x21   : > { %521 = vmatpush1.bf16.msra.mxu1 %v991_v21  ;;  %909 = vmatprep.subr.msk.bf16.mxu0 %vm248_vm0, %v908_v22 }
  0x22   : > { %911 = vmatprep.subr.msk.bf16.mxu1 %vm248_vm0, %v908_v22  ;;  %505 = vmatprep.mubr.bf16.mxu0 %v1014_v3 }
  0x23   : > { %552 = vmatprep.mubr.bf16.mxu1 %v1014_v3 }
  0x24   : > { %476 = vmatpush1.bf16.msra.mxu0 %v468_v24 }
  0x25   : > { %523 = vmatpush1.bf16.msra.mxu1 %v468_v24  ;;  %589 = vmatprep.subr.bf16.mxu0 %v998_v25 }
  0x26   : > { %636 = vmatprep.subr.bf16.mxu1 %v998_v25 }
  0x2b   : > { %910 = vmatmul.mubr.msk.bf16.vlgmr.msra.gmra.mrb[0].mxu0 %vm244_vm1, %v361_v14 }
  0x2c   : > { %912 = vmatmul.mubr.msk.bf16.vlgmr.msra.gmra.mrb[0].mxu1 %vm244_vm1, %v516_v28  ;;  %590 = vmatpush1.bf16.msra.mxu0 %v996_v29 }
  0x2d   : > { %637 = vmatpush1.bf16.msra.mxu1 %v996_v29  ;;  %920 = vmatprep.subr.msk.bf16.mxu0 %vm248_vm0, %v919_v30 }
  0x2e   : > { %922 = vmatprep.subr.msk.bf16.mxu1 %vm248_vm0, %v919_v30  ;;  %621 = vmatprep.mubr.bf16.mxu0 %v1014_v3 }
  0x2f   : > { %668 = vmatprep.mubr.bf16.mxu1 %v1014_v3 }
  0x30   : > { %592 = vmatpush1.bf16.msra.mxu0 %v584_v32 }
  0x31   : > { %639 = vmatpush1.bf16.msra.mxu1 %v584_v32  ;;  %705 = vmatprep.subr.bf16.mxu0 %v1003_v33 }
  0x32   : > { %752 = vmatprep.subr.bf16.mxu1 %v1003_v33 }
  0x37   : > { %921 = vmatmul.mubr.msk.bf16.vlgmr.msra.gmra.mrb[0].mxu0 %vm244_vm1, %v516_v28 }
  0x38   : > { %923 = vmatmul.mubr.msk.bf16.vlgmr.msra.gmra.mrb[0].mxu1 %vm244_vm1, %v632_v36  ;;  %706 = vmatpush1.bf16.msra.mxu0 %v1001_v37 }
  0x39   : > { %753 = vmatpush1.bf16.msra.mxu1 %v1001_v37  ;;  %931 = vmatprep.subr.msk.bf16.mxu0 %vm248_vm0, %v930_v38 }
  0x3a   : > { %933 = vmatprep.subr.msk.bf16.mxu1 %vm248_vm0, %v930_v38  ;;  %737 = vmatprep.mubr.bf16.mxu0 %v1014_v3 }
  0x3b   : > { %784 = vmatprep.mubr.bf16.mxu1 %v1014_v3 }
  0x3c   : > { %708 = vmatpush1.bf16.msra.mxu0 %v700_v40 }
  0x3d   : > { %755 = vmatpush1.bf16.msra.mxu1 %v700_v40 }
  0x43   : > { %932 = vmatmul.mubr.msk.bf16.vlgmr.msra.gmra.mrb[0].mxu0 %vm244_vm1, %v632_v36 }
  0x44   : > { %934 = vmatmul.mubr.msk.bf16.vlgmr.msra.gmra.mrb[0].mxu1 %vm244_vm1, %v748_v42 }
 0x116   : > { %v739_v43 = vpop.f32.mrb[0].mxu0 }
 0x117   : > { %v786_v44 = vpop.f32.mrb[0].mxu1  ;;  %v741_v46 = vpop.f32.mrb[1].mxu0 }
 0x118   : > { %v795_v45 = vmax.f32 %v739_v43, %v786_v44  ;;  %v788_v47 = vpop.f32.mrb[1].mxu1  ;;  %v743_v49 = vpop.f32.mrb[2].mxu0 }
 0x119   : > { %v796_v48 = vmax.f32 %v741_v46, %v788_v47  ;;  %v790_v50 = vpop.f32.mrb[2].mxu1  ;;  %v744_v52 = vpop.f32.mrb[3].mxu0 }
 0x11a   : > { %v791_v53 = vpop.f32.mrb[3].mxu1 }
 0x11b   : > { %v797_v54 = vmax.f32 %v795_v45, %v796_v48 }
 0x11d   : > { %v805_v55 = vadd.f32 %v935_v51, %v797_v54 }
 0x11f   : > { %v806_v56 = vmax.f32 %v805_v55, 0.0 }
 0x121   : > { %807 = vst [vmem:[%s215_s9] sm:$0xff] %v806_v56 }
 0x122 PF: > { %s14_s15 = sadd.s32 1, %s1012_s15  }
 0x123   : > { %p11_p4 = scmp.ge.s32.totalorder %s14_s15, 4  }
 0x125   :  { %13 = sbr.rel (!%p11_p4) target bundleno = 1 (0x1), region = 73 }

// kernel: cnn_forward.3
= control target key start
LH: loop header
LB: loop body
LE: loop exit
PB: predicated region body
PF: predicated region fallthrough
CT: control target
= control target key end

     0   :  { %11 = vsyncpa [#allocation3], 0  ;;  %s3511_s0 = inlined_call_operand.vmem [shape: f32[2,6,192], index: 0, kind: input, shape index: {}]   ;;  %s3512_s1 = inlined_call_operand.vmem [shape: f32[2,6,192], index: 1, kind: input, shape index: {}]   ;;  %s3513_s2 = inlined_call_operand.vmem [shape: bf16[5,192,256], index: 2, kind: input, shape index: {}]   ;;  %s3514_s3 = inlined_call_operand.vmem [shape: f32[1,128], index: 3, kind: input, shape index: {}]   ;;  %s3515_s4 = inlined_call_operand.vmem [shape: bf16[4,128,128], index: 4, kind: input, shape index: {}]   ;;  %s3516_s5 = inlined_call_operand.vmem [shape: f32[1,128], index: 5, kind: input, shape index: {}]   ;;  %s3517_s6 = inlined_call_operand.hbm [shape: f32[2,1,128], index: 6, kind: output, shape index: {}]  }
   0x1   :  { %13 = vsyncpa [#allocation3 + $0x1], 0  ;;  %s2848_s21 = smov 0   ;;  %s2850_s22 = smov 0  }
   0x2   :  { %s2852_s23 = smov 0   ;;  %s2854_s24 = smov 0  }
   0x3 LB: > { %s2869_s25 = sadd.s32 4294967295, %s2808_s24   ;;  %s2025_s26 = sadd.s32 4294967294, %s2808_s24   ;;  %s2808_s24 = sphi %s2854_s24, %s3523_s24   ;;  %s2804_s23 = sphi %s2852_s23, %s3522_s23   ;;  %s2800_s22 = sphi %s2850_s22, %s3521_s22   ;;  %s2796_s21 = sphi %s2848_s21, %s3520_s21  }
   0x4   : > { %s2873_s27 = sadd.s32 1, %s2808_s24   ;;  %s162_s28 = sadd.s32 1, %s2804_s23 }
   0x5   : > { %s159_s29 = ssub.s32 %s2808_s24, %s2873_s27  ;;  %p172_p0 = scmp.ne.s32.totalorder %s2804_s23, %s2800_s22 }
   0x6   : > { %p160_p1 = scmp.eq.s32.totalorder %s159_s29, 0  ;;  %p173_p2 = scmp.eq.s32.totalorder %s2869_s25, 1 }
   0x7   : > { %p178_p3 = scmp.ne.s32.totalorder %s2800_s22, %s2796_s21  ;;  %p179_p4 = scmp.eq.s32.totalorder %s2025_s26, 1 }
   0x8   : > { %s2884_s30 = scalar_select %p160_p1, %s2804_s23, %s162_s28  }
   0x9   : > { %p2886_p5 = por %p173_p2, %p172_p0  ;;  %p2890_p6 = por %p179_p4, %p178_p3 }
   0xa   : > { %p2028_p7 = scmp.ge.s32.totalorder %s2808_s24, 1  ;;  %p225_p8 = scmp.lt.s32.totalorder %s2808_s24, 3 }
   0xc   : > { %p226_p9 = pnand %p2028_p7, %p225_p8 }
   0xd   : > { %v2534_v0 = vld [vmem:[%s3513_s2 + $0xc4] ss:$8 sps:$4 sm:$0xff] (!%p226_p9)   ;;  %v2536_v1 = vld [vmem:[%s3513_s2 + $0xc0] ss:$8 sps:$4 sm:$0xff] (!%p226_p9)   ;;  %v2537_v2 = vld [vmem:[%s3513_s2 + $0xd4] ss:$8 sps:$4 sm:$0xff] (!%p226_p9)  }
   0xe   : > { %229 = sbr.rel (%p226_p9) target bundleno = 743 (0x2e7), region = 44  ;;  %453 = vmatprep.subr.bf16.mxu0 (!%p226_p9), %v2534_v0  ;;  %678 = vmatprep.subr.bf16.mxu1 (!%p226_p9), %v2534_v0  ;;  %v2539_v3 = vld [vmem:[%s3513_s2 + $0xd0] ss:$8 sps:$4 sm:$0xff] (!%p226_p9)   ;;  %p259_p10 = scmp.lt.s32.totalorder (!%p226_p9), %s2869_s25, 1  ;;  %v2540_v4 = vld [vmem:[%s3513_s2 + $0xe4] ss:$8 sps:$4 sm:$0xff] (!%p226_p9)  }
   0xf   : > { %454 = vmatpush1.bf16.msra.mxu0 (!%p226_p9), %v2536_v1  ;;  %679 = vmatpush1.bf16.msra.mxu1 (!%p226_p9), %v2536_v1  ;;  %v2542_v5 = vld [vmem:[%s3513_s2 + $0xe0] ss:$8 sps:$4 sm:$0xff] (!%p226_p9)   ;;  %v2543_v6 = vld [vmem:[%s3513_s2 + $0xf4] ss:$8 sps:$4 sm:$0xff] (!%p226_p9)   ;;  %v2545_v7 = vld [vmem:[%s3513_s2 + $0xf0] ss:$8 sps:$4 sm:$0xff] (!%p226_p9)  }
  0x10   : > { %455 = vmatprep.subr.bf16.mxu0 (!%p226_p9), %v2537_v2  ;;  %680 = vmatprep.subr.bf16.mxu1 (!%p226_p9), %v2537_v2  ;;  %v2546_v8 = vld [vmem:[%s3513_s2 + $0x104] ss:$8 sps:$4 sm:$0xff] (!%p226_p9)   ;;  %v2548_v9 = vld [vmem:[%s3513_s2 + $0x100] ss:$8 sps:$4 sm:$0xff] (!%p226_p9)   ;;  %v2549_v10 = vld [vmem:[%s3513_s2 + $0x114] ss:$8 sps:$4 sm:$0xff] (!%p226_p9)  }
  0x11   : > { %vm449_vm0 = vcmask (!%p226_p9), 523264   ;;  %v2551_v15 = vld [vmem:[%s3513_s2 + $0x110] ss:$8 sps:$4 sm:$0xff] (!%p226_p9)   ;;  %v2552_v16 = vld [vmem:[%s3513_s2 + $0x124] ss:$8 sps:$4 sm:$0xff] (!%p226_p9)   ;;  %vm2811_vm1 = vmmov (!%p226_p9), 0  }
  0x12   : > { %v2554_v20 = vld [vmem:[%s3513_s2 + $0x120] ss:$8 sps:$4 sm:$0xff] (!%p226_p9)   ;;  %v2555_v21 = vld [vmem:[%s3513_s2 + $0x134] ss:$8 sps:$4 sm:$0xff] (!%p226_p9)   ;;  %v2557_v23 = vld [vmem:[%s3513_s2 + $0x130] ss:$8 sps:$4 sm:$0xff] (!%p226_p9)  }
  0x13   : > { %456 = vmatpush1.bf16.msra.mxu0 (!%p226_p9), %v2539_v3  ;;  %681 = vmatpush1.bf16.msra.mxu1 (!%p226_p9), %v2539_v3  ;;  %v2558_v24 = vld [vmem:[%s3513_s2 + $0x144] ss:$8 sps:$4 sm:$0xff] (!%p226_p9)   ;;  %v2560_v25 = vld [vmem:[%s3513_s2 + $0x140] ss:$8 sps:$4 sm:$0xff] (!%p226_p9)   ;;  %v2561_v27 = vld [vmem:[%s3513_s2 + $0x154] ss:$8 sps:$4 sm:$0xff] (!%p226_p9)  }
  0x14   : > { %457 = vmatprep.subr.bf16.mxu0 (!%p226_p9), %v2540_v4  ;;  %682 = vmatprep.subr.bf16.mxu1 (!%p226_p9), %v2540_v4  ;;  %v2563_v29 = vld [vmem:[%s3513_s2 + $0x150] ss:$8 sps:$4 sm:$0xff] (!%p226_p9)   ;;  %v2564_v30 = vld [vmem:[%s3513_s2 + $0x164] ss:$8 sps:$4 sm:$0xff] (!%p226_p9)   ;;  %v2566_v32 = vld [vmem:[%s3513_s2 + $0x160] ss:$8 sps:$4 sm:$0xff] (!%p226_p9)  }
  0x15   : > { %s260_s26 = scalar_select %p259_p10, %s2869_s25, 1  ;;  %v2567_v33 = vld [vmem:[%s3513_s2 + $0x174] ss:$8 sps:$4 sm:$0xff]   ;;  %v2569_v34 = vld [vmem:[%s3513_s2 + $0x170] ss:$8 sps:$4 sm:$0xff]  }
  0x16   : > { %v2572_v38 = vld [vmem:[%s3513_s2 + $0x4] ss:$8 sps:$4 sm:$0xff]   ;;  %v2570_v42 = vld [vmem:[%s3513_s2] ss:$8 sps:$4 sm:$0xff]   ;;  %v2575_v43 = vld [vmem:[%s3513_s2 + $0x14] ss:$8 sps:$4 sm:$0xff]  }
  0x17   : > { %458 = vmatpush1.bf16.msra.mxu0 %v2542_v5  ;;  %683 = vmatpush1.bf16.msra.mxu1 %v2542_v5  ;;  %s2343_s11 = sshll.u32 %s260_s26, 4  ;;  %v2573_v45 = vld [vmem:[%s3513_s2 + $0x10] ss:$8 sps:$4 sm:$0xff]   ;;  %v2578_v46 = vld [vmem:[%s3513_s2 + $0x24] ss:$8 sps:$4 sm:$0xff]   ;;  %s257_s28 = sand.u32 1, %s2800_s22  }
  0x18   : > { %459 = vmatprep.subr.bf16.mxu0 %v2543_v6  ;;  %684 = vmatprep.subr.bf16.mxu1 %v2543_v6  ;;  %s2928_s16 = scalar_lea.vmem %s3512_s1, %s2343_s11  ;;  %s2933_s19 = scalar_lea.vmem %s3511_s0, %s2343_s11  ;;  %v2576_v47 = vld [vmem:[%s3513_s2 + $0x20] ss:$8 sps:$4 sm:$0xff]   ;;  %v2581_v48 = vld [vmem:[%s3513_s2 + $0x34] ss:$8 sps:$4 sm:$0xff]   ;;  %v2579_v49 = vld [vmem:[%s3513_s2 + $0x30] ss:$8 sps:$4 sm:$0xff]  }
  0x19   : > { %v297_v11 = vld [vmem:[%s2928_s16 + $0x8] sm:$0xf]  ;;  %v327_v26 = vld [vmem:[%s2933_s19] sm:$0x1e]  ;;  %v2587_v52 = vld [vmem:[%s3513_s2 + $0x54] ss:$8 sps:$4 sm:$0xff]  }
  0x1a   : > { %v2942_v12 = vpack.c.bf16 %v297_v11, %v297_v11  ;;  %v328_v13 = vld [vmem:[%s2933_s19 + $0x8] sm:$0x1e]  ;;  %v658_v28 = vpack.c.bf16 %v327_v26, %v327_v26  ;;  %v296_v37 = vld [vmem:[%s2928_s16] sm:$0xf]  ;;  %v2585_v53 = vld [vmem:[%s3513_s2 + $0x50] ss:$8 sps:$4 sm:$0xff]  }
  0x1b   : > { %460 = vmatpush1.bf16.msra.mxu0 %v2545_v7  ;;  %685 = vmatpush1.bf16.msra.mxu1 %v2545_v7  ;;  %v659_v14 = vpack.c.bf16 %v328_v13, %v328_v13  ;;  %v2995_v39 = vpack.c.bf16 %v296_v37, %v296_v37  ;;  %v295_v41 = vld [vmem:[%s2933_s19 + $0x8] sm:$0xf]  ;;  %v2584_v50 = vld [vmem:[%s3513_s2 + $0x44] ss:$8 sps:$4 sm:$0xff]   ;;  %v2593_v56 = vld [vmem:[%s3513_s2 + $0x74] ss:$8 sps:$4 sm:$0xff]  }
  0x1c   : > { %461 = vmatprep.subr.bf16.mxu0 %v2546_v8  ;;  %686 = vmatprep.subr.bf16.mxu1 %v2546_v8  ;;  %v663_v31 = vshll.u32 %v658_v28, 16  ;;  %v661_v35 = vshrl.u32 %v658_v28, 16  ;;  %v299_v44 = vpack.c.bf16 %v295_v41, %v295_v41  ;;  %v2582_v51 = vld [vmem:[%s3513_s2 + $0x40] ss:$8 sps:$4 sm:$0xff]   ;;  %v2590_v54 = vld [vmem:[%s3513_s2 + $0x64] ss:$8 sps:$4 sm:$0xff]  }
  0x1d   : > { %v668_v17 = vshrl.u32 %v659_v14, 16  ;;  %v670_v18 = vshll.u32 %v659_v14, 16  ;;  %2081 = vmatprep.mubr.msk.bf16.mxu0 %vm449_vm0, %v2942_v12  ;;  %v2588_v55 = vld [vmem:[%s3513_s2 + $0x60] ss:$8 sps:$4 sm:$0xff]   ;;  %v2591_v57 = vld [vmem:[%s3513_s2 + $0x70] ss:$8 sps:$4 sm:$0xff]  }
  0x1e   : > { %v665_v36 = vrot.slane %v663_v31, 1  ;;  %v2596_v58 = vld [vmem:[%s3513_s2 + $0x84] ss:$8 sps:$4 sm:$0xff]   ;;  %v2594_v59 = vld [vmem:[%s3513_s2 + $0x80] ss:$8 sps:$4 sm:$0xff]   ;;  %s2340_s10 = sshll.u32 %s2869_s25, 4 }
  0x1f   : > { %462 = vmatpush1.bf16.msra.mxu0 %v2548_v9  ;;  %687 = vmatpush1.bf16.msra.mxu1 %v2548_v9  ;;  %v672_v19 = vrot.slane %v670_v18, 1  ;;  %v2599_v60 = vld [vmem:[%s3513_s2 + $0x94] ss:$8 sps:$4 sm:$0xff]   ;;  %v786_v61 = vld [vmem:[%s2928_s16 + $0x8] sm:$0x1e]  ;;  %s258_s11 = scalar_lea.vmem [#allocation2], %s257_s28  ;;  %s3469_s14 = scalar_lea.hbm %s3517_s6, %s2340_s10 }
  0x20   : > { %463 = vmatprep.subr.bf16.mxu0 %v2549_v10  ;;  %688 = vmatprep.subr.bf16.mxu1 %v2549_v10  ;;  %v2997_v40 = vor.u32 %v665_v36, %v661_v35  ;;  %v2597_v62 = vld [vmem:[%s3513_s2 + $0x90] ss:$8 sps:$4 sm:$0xff]   ;;  %v2602_v63 = vld [vmem:[%s3513_s2 + $0xa4] ss:$8 sps:$4 sm:$0xff]   ;;  %v951_v0 = vpack.c.bf16 %v786_v61, %v786_v61  ;;  %v2600_v1 = vld [vmem:[%s3513_s2 + $0xa0] ss:$8 sps:$4 sm:$0xff]  }
  0x21   : > { %v2959_v22 = vor.u32 %v672_v19, %v668_v17  ;;  %v2605_v2 = vld [vmem:[%s3513_s2 + $0xb4] ss:$8 sps:$4 sm:$0xff]   ;;  %v2603_v4 = vld [vmem:[%s3513_s2 + $0xb0] ss:$8 sps:$4 sm:$0xff]   ;;  %v2608_v5 = vld [vmem:[%s3513_s2 + $0x184] ss:$8 sps:$4 sm:$0xff]  }
  0x22   : > { %v962_v3 = vshll.u32 %v951_v0, 16  ;;  %v294_v6 = vld [vmem:[%s2933_s19] sm:$0xf]  ;;  %v960_v7 = vshrl.u32 %v951_v0, 16  ;;  %v2611_v11 = vld [vmem:[%s3513_s2 + $0x194] ss:$8 sps:$4 sm:$0xff]  }
  0x23   : > { %464 = vmatpush1.bf16.msra.mxu0 %v2551_v15  ;;  %689 = vmatpush1.bf16.msra.mxu1 %v2551_v15  ;;  %v298_v9 = vpack.c.bf16 %v294_v6, %v294_v6  ;;  %v2606_v10 = vld [vmem:[%s3513_s2 + $0x180] ss:$8 sps:$4 sm:$0xff]   ;;  %v2609_v13 = vld [vmem:[%s3513_s2 + $0x190] ss:$8 sps:$4 sm:$0xff]   ;;  %v2614_v14 = vld [vmem:[%s3513_s2 + $0x1a4] ss:$8 sps:$4 sm:$0xff]  }
  0x24   : > { %465 = vmatprep.subr.bf16.mxu0 %v2552_v16  ;;  %690 = vmatprep.subr.bf16.mxu1 %v2552_v16  ;;  %v964_v8 = vrot.slane %v962_v3, 1  ;;  %v2612_v15 = vld [vmem:[%s3513_s2 + $0x1a0] ss:$8 sps:$4 sm:$0xff]   ;;  %v2617_v16 = vld [vmem:[%s3513_s2 + $0x1b4] ss:$8 sps:$4 sm:$0xff]   ;;  %s1946_s15 = scalar_lea.sflag [#allocation3], %s257_s28 }
  0x25   : > { %2107 = vmatprep.mubr.msk.bf16.mxu1 %vm449_vm0, %v2959_v22  ;;  %v2615_v17 = vld [vmem:[%s3513_s2 + $0x1b0] ss:$8 sps:$4 sm:$0xff]   ;;  %v2620_v18 = vld [vmem:[%s3513_s2 + $0x1c4] ss:$8 sps:$4 sm:$0xff]   ;;  %v2618_v19 = vld [vmem:[%s3513_s2 + $0x1c0] ss:$8 sps:$4 sm:$0xff]  }
  0x26   : > { %v2632_v26 = vld [vmem:[%s3513_s2 + $0x204] ss:$8 sps:$4 sm:$0xff]   ;;  %v2633_v31 = vld [vmem:[%s3513_s2 + $0x210] ss:$8 sps:$4 sm:$0xff]   ;;  %v2641_v35 = vld [vmem:[%s3513_s2 + $0x234] ss:$8 sps:$4 sm:$0xff]  }
  0x27   : > { %466 = vmatpush1.bf16.msra.mxu0 %v2554_v20  ;;  %691 = vmatpush1.bf16.msra.mxu1 %v2554_v20  ;;  %v2623_v20 = vld [vmem:[%s3513_s2 + $0x1d4] ss:$8 sps:$4 sm:$0xff]   ;;  %v785_v28 = vld [vmem:[%s2928_s16] sm:$0x1e]  ;;  %s2812_s25 = smov [#allocation2]  }
  0x28   : > { %467 = vmatprep.subr.bf16.mxu0 %v2555_v21  ;;  %692 = vmatprep.subr.bf16.mxu1 %v2555_v21  ;;  %v2621_v21 = vld [vmem:[%s3513_s2 + $0x1d0] ss:$8 sps:$4 sm:$0xff]   ;;  %v2644_v41 = vld [vmem:[%s3513_s2 + $0x244] ss:$8 sps:$4 sm:$0xff]   ;;  %v2671_v61 = vld [vmem:[%s3513_s2 + $0x2d4] ss:$8 sps:$4 sm:$0xff]  }
  0x29   : > { %v2672_v0 = vld [vmem:[%s3513_s2 + $0x2e0] ss:$8 sps:$4 sm:$0xff]   ;;  %v2680_v6 = vld [vmem:[%s3513_s2 + $0x304] ss:$8 sps:$4 sm:$0xff]   ;;  %s2750_s17 = sshll.u32 %s2812_s25, 4  ;;  %s2751_s17 = int_to_ptr.vmem [resolvable:$false] %s2750_s17 }
  0x2a   : > { %s2752_s18 = scalar_lea.vmem %s2751_s17, 32 }
  0x2b   : > { %468 = vmatpush1.bf16.msra.mxu0 %v2557_v23  ;;  %693 = vmatpush1.bf16.msra.mxu1 %v2557_v23  ;;  %v2624_v23 = vld [vmem:[%s3513_s2 + $0x1e0] ss:$8 sps:$4 sm:$0xff]  }
  0x2c   : > { %469 = vmatprep.subr.bf16.mxu0 %v2558_v24  ;;  %694 = vmatprep.subr.bf16.mxu1 %v2558_v24  ;;  %v2629_v24 = vld [vmem:[%s3513_s2 + $0x1f4] ss:$8 sps:$4 sm:$0xff]  }
  0x2f   : > { %470 = vmatpush1.bf16.msra.mxu0 %v2560_v25  ;;  %695 = vmatpush1.bf16.msra.mxu1 %v2560_v25  ;;  %v2627_v25 = vld [vmem:[%s3513_s2 + $0x1f0] ss:$8 sps:$4 sm:$0xff]  }
  0x30   : > { %471 = vmatprep.subr.bf16.mxu0 %v2561_v27  ;;  %696 = vmatprep.subr.bf16.mxu1 %v2561_v27  ;;  %v2630_v27 = vld [vmem:[%s3513_s2 + $0x200] ss:$8 sps:$4 sm:$0xff]  }
  0x33   : > { %472 = vmatpush1.bf16.msra.mxu0 %v2563_v29  ;;  %697 = vmatpush1.bf16.msra.mxu1 %v2563_v29  ;;  %v2635_v29 = vld [vmem:[%s3513_s2 + $0x214] ss:$8 sps:$4 sm:$0xff]  }
  0x34   : > { %473 = vmatprep.subr.bf16.mxu0 %v2564_v30  ;;  %698 = vmatprep.subr.bf16.mxu1 %v2564_v30  ;;  %v950_v30 = vpack.c.bf16 %v785_v28, %v785_v28  ;;  %v2705_v28 = vld [vmem:[%s3513_s2 + $0x390] ss:$8 sps:$4 sm:$0xff]  }
  0x36   : > { %v953_v36 = vshrl.u32 %v950_v30, 16 }
  0x37   : > { %474 = vmatpush1.bf16.msra.mxu0 %v2566_v32  ;;  %699 = vmatpush1.bf16.msra.mxu1 %v2566_v32  ;;  %v2638_v32 = vld [vmem:[%s3513_s2 + $0x224] ss:$8 sps:$4 sm:$0xff]  }
  0x38   : > { %475 = vmatprep.subr.bf16.mxu0 %v2567_v33  ;;  %700 = vmatprep.subr.bf16.mxu1 %v2567_v33  ;;  %v955_v33 = vshll.u32 %v950_v30, 16  ;;  %v2708_v30 = vld [vmem:[%s3513_s2 + $0x3a0] ss:$8 sps:$4 sm:$0xff]  }
  0x3a   : > { %v957_v37 = vrot.slane %v955_v33, 1 }
  0x3b   : > { %476 = vmatpush1.bf16.msra.mxu0 %v2569_v34  ;;  %701 = vmatpush1.bf16.msra.mxu1 %v2569_v34  ;;  %v2636_v34 = vld [vmem:[%s3513_s2 + $0x220] ss:$8 sps:$4 sm:$0xff]  }
  0x3c   : > { %617 = vmatprep.subr.bf16.mxu0 %v2572_v38  ;;  %719 = vmatprep.subr.bf16.mxu1 %v2572_v38  ;;  %v1039_v38 = vld [vmem:[%s2933_s19 + $0x8] sm:$0x3c] }
  0x3e   : > { %486 = vmatmul.mubr.bf16.vlgmr.msra.gmra.mrb[0].mxu0 %v2995_v39  ;;  %711 = vmatmul.mubr.bf16.vlgmr.msra.gmra.mrb[0].mxu1 %v2997_v40 }
  0x3f   : > { %618 = vmatpush1.bf16.msra.mxu0 %v2570_v42  ;;  %720 = vmatpush1.bf16.msra.mxu1 %v2570_v42  ;;  %v1204_v42 = vpack.c.bf16 %v1039_v38, %v1039_v38  ;;  %v2810_v38 = vmov 0.0  }
  0x40   : > { %619 = vmatprep.subr.bf16.mxu0 %v2575_v43  ;;  %721 = vmatprep.subr.bf16.mxu1 %v2575_v43  ;;  %v3160_v43 = vor.u32 %v957_v37, %v953_v36  ;;  %v2714_v36 = vld [vmem:[%s3515_s4] sm:$0xff]  }
  0x41   : > { %2106 = vmatprep.mubr.msk.bf16.mxu0 %vm449_vm0, %v299_v44  ;;  %2108 = vmatprep.mubr.msk.bf16.mxu1 %vm449_vm0, %v2942_v12  ;;  %v3085_v12 = vor.u32 %v964_v8, %v960_v7  ;;  %v2642_v44 = vld [vmem:[%s3513_s2 + $0x240] ss:$8 sps:$4 sm:$0xff]  }
  0x42   : > { %v2715_v37 = vld [vmem:[%s3515_s4 + $0x40] sm:$0xff]  }
  0x43   : > { %620 = vmatpush1.bf16.msra.mxu0 %v2573_v45  ;;  %722 = vmatpush1.bf16.msra.mxu1 %v2573_v45  ;;  %v2647_v45 = vld [vmem:[%s3513_s2 + $0x254] ss:$8 sps:$4 sm:$0xff]  }
  0x44   : > { %621 = vmatprep.subr.bf16.mxu0 %v2578_v46  ;;  %723 = vmatprep.subr.bf16.mxu1 %v2578_v46  ;;  %v3168_v46 = vrot.slane %v1204_v42, 1  ;;  %v2718_v42 = vld [vmem:[%s3515_s4 + $0x10] sm:$0xff]  }
  0x47   : > { %622 = vmatpush1.bf16.msra.mxu0 %v2576_v47  ;;  %724 = vmatpush1.bf16.msra.mxu1 %v2576_v47  ;;  %v2645_v47 = vld [vmem:[%s3513_s2 + $0x250] ss:$8 sps:$4 sm:$0xff]  }
  0x48   : > { %623 = vmatprep.subr.bf16.mxu0 %v2581_v48  ;;  %725 = vmatprep.subr.bf16.mxu1 %v2581_v48  ;;  %v2650_v48 = vld [vmem:[%s3513_s2 + $0x264] ss:$8 sps:$4 sm:$0xff]  }
  0x4b   : > { %624 = vmatpush1.bf16.msra.mxu0 %v2579_v49  ;;  %726 = vmatpush1.bf16.msra.mxu1 %v2579_v49  ;;  %v2653_v49 = vld [vmem:[%s3513_s2 + $0x274] ss:$8 sps:$4 sm:$0xff]  }
  0x4c   : > { %625 = vmatprep.subr.bf16.mxu0 %v2584_v50  ;;  %727 = vmatprep.subr.bf16.mxu1 %v2584_v50  ;;  %v2651_v50 = vld [vmem:[%s3513_s2 + $0x270] ss:$8 sps:$4 sm:$0xff]  }
  0x4f   : > { %626 = vmatpush1.bf16.msra.mxu0 %v2582_v51  ;;  %728 = vmatpush1.bf16.msra.mxu1 %v2582_v51  ;;  %v2656_v51 = vld [vmem:[%s3513_s2 + $0x284] ss:$8 sps:$4 sm:$0xff]  }
  0x50   : > { %627 = vmatprep.subr.bf16.mxu0 %v2587_v52  ;;  %729 = vmatprep.subr.bf16.mxu1 %v2587_v52  ;;  %v2654_v52 = vld [vmem:[%s3513_s2 + $0x280] ss:$8 sps:$4 sm:$0xff]  }
  0x53   : > { %628 = vmatpush1.bf16.msra.mxu0 %v2585_v53  ;;  %730 = vmatpush1.bf16.msra.mxu1 %v2585_v53  ;;  %v2659_v53 = vld [vmem:[%s3513_s2 + $0x294] ss:$8 sps:$4 sm:$0xff]  }
  0x54   : > { %629 = vmatprep.subr.bf16.mxu0 %v2590_v54  ;;  %731 = vmatprep.subr.bf16.mxu1 %v2590_v54  ;;  %v2657_v54 = vld [vmem:[%s3513_s2 + $0x290] ss:$8 sps:$4 sm:$0xff]  }
  0x57   : > { %630 = vmatpush1.bf16.msra.mxu0 %v2588_v55  ;;  %732 = vmatpush1.bf16.msra.mxu1 %v2588_v55  ;;  %v2662_v55 = vld [vmem:[%s3513_s2 + $0x2a4] ss:$8 sps:$4 sm:$0xff]  }
  0x58   : > { %631 = vmatprep.subr.bf16.mxu0 %v2593_v56  ;;  %733 = vmatprep.subr.bf16.mxu1 %v2593_v56  ;;  %v2660_v56 = vld [vmem:[%s3513_s2 + $0x2a0] ss:$8 sps:$4 sm:$0xff]  }
  0x5b   : > { %632 = vmatpush1.bf16.msra.mxu0 %v2591_v57  ;;  %734 = vmatpush1.bf16.msra.mxu1 %v2591_v57  ;;  %v2665_v57 = vld [vmem:[%s3513_s2 + $0x2b4] ss:$8 sps:$4 sm:$0xff]  }
  0x5c   : > { %633 = vmatprep.subr.bf16.mxu0 %v2596_v58  ;;  %735 = vmatprep.subr.bf16.mxu1 %v2596_v58  ;;  %v2663_v58 = vld [vmem:[%s3513_s2 + $0x2b0] ss:$8 sps:$4 sm:$0xff]  }
  0x5f   : > { %634 = vmatpush1.bf16.msra.mxu0 %v2594_v59  ;;  %736 = vmatpush1.bf16.msra.mxu1 %v2594_v59  ;;  %v2668_v59 = vld [vmem:[%s3513_s2 + $0x2c4] ss:$8 sps:$4 sm:$0xff]  }
  0x60   : > { %635 = vmatprep.subr.bf16.mxu0 %v2599_v60  ;;  %737 = vmatprep.subr.bf16.mxu1 %v2599_v60  ;;  %v2666_v60 = vld [vmem:[%s3513_s2 + $0x2c0] ss:$8 sps:$4 sm:$0xff]  }
  0x63   : > { %636 = vmatpush1.bf16.msra.mxu0 %v2597_v62  ;;  %738 = vmatpush1.bf16.msra.mxu1 %v2597_v62  ;;  %v2669_v62 = vld [vmem:[%s3513_s2 + $0x2d0] ss:$8 sps:$4 sm:$0xff]  }
  0x64   : > { %637 = vmatprep.subr.bf16.mxu0 %v2602_v63  ;;  %739 = vmatprep.subr.bf16.mxu1 %v2602_v63  ;;  %v2674_v63 = vld [vmem:[%s3513_s2 + $0x2e4] ss:$8 sps:$4 sm:$0xff]  }
  0x67   : > { %638 = vmatpush1.bf16.msra.mxu0 %v2600_v1  ;;  %740 = vmatpush1.bf16.msra.mxu1 %v2600_v1  ;;  %v1038_v1 = vld [vmem:[%s2933_s19] sm:$0x3c]  ;;  %s1958_s19 = sshll.u32 %s258_s11, 4  ;;  %s3471_s19 = int_to_ptr.vmem [resolvable:$true] %s1958_s19 }
  0x68   : > { %639 = vmatprep.subr.bf16.mxu0 %v2605_v2  ;;  %741 = vmatprep.subr.bf16.mxu1 %v2605_v2  ;;  %v2677_v2 = vld [vmem:[%s3513_s2 + $0x2f4] ss:$8 sps:$4 sm:$0xff]   ;;  %v1203_v3 = vpack.c.bf16 %v1038_v1, %v1038_v1  ;;  %p2753_p0 = scmp.lt.s32.totalorder %s3471_s19, %s2751_s17 }
  0x6a   : > { %v3244_v8 = vrot.slane %v1203_v3, 1  ;;  %v2730_v3 = vld [vmem:[%s3515_s4 + $0xc0] sm:$0xff]  }
  0x6b   : > { %640 = vmatpush1.bf16.msra.mxu0 %v2603_v4  ;;  %742 = vmatpush1.bf16.msra.mxu1 %v2603_v4  ;;  %v1282_v4 = vld [vmem:[%s2928_s16 + $0x8] sm:$0x3c] }
  0x6c   : > { %907 = vmatprep.subr.bf16.mxu0 %v2608_v5  ;;  %970 = vmatprep.subr.bf16.mxu1 %v2608_v5  ;;  %v2675_v5 = vld [vmem:[%s3513_s2 + $0x2f0] ss:$8 sps:$4 sm:$0xff]   ;;  %v1447_v7 = vpack.c.bf16 %v1282_v4, %v1282_v4 }
  0x6e   : > { %650 = vmatmul.mubr.bf16.vlgmr.msra.gmra.mrb[0].mxu0 %v298_v9  ;;  %752 = vmatmul.mubr.bf16.vlgmr.msra.gmra.mrb[0].mxu1 %v2995_v39  ;;  %v2639_v39 = vld [vmem:[%s3513_s2 + $0x230] ss:$8 sps:$4 sm:$0xff]   ;;  %v2678_v9 = vld [vmem:[%s3513_s2 + $0x300] ss:$8 sps:$4 sm:$0xff]  }
  0x6f   : > { %908 = vmatpush1.bf16.msra.mxu0 %v2606_v10  ;;  %971 = vmatpush1.bf16.msra.mxu1 %v2606_v10  ;;  %v2683_v10 = vld [vmem:[%s3513_s2 + $0x314] ss:$8 sps:$4 sm:$0xff]  }
  0x70   : > { %909 = vmatprep.subr.bf16.mxu0 %v2611_v11  ;;  %972 = vmatprep.subr.bf16.mxu1 %v2611_v11  ;;  %v1451_v11 = vrot.slane %v1447_v7, 1  ;;  %v2732_v7 = vld [vmem:[%s3515_s4 + $0xc8] sm:$0xff]  }
  0x71   : > { %2157 = vmatprep.mubr.msk.bf16.mxu0 %vm449_vm0, %v2959_v22  ;;  %2158 = vmatprep.mubr.msk.bf16.mxu1 %vm449_vm0, %v3085_v12  ;;  %v2626_v22 = vld [vmem:[%s3513_s2 + $0x1e4] ss:$8 sps:$4 sm:$0xff]  }
  0x73   : > { %910 = vmatpush1.bf16.msra.mxu0 %v2609_v13  ;;  %973 = vmatpush1.bf16.msra.mxu1 %v2609_v13  ;;  %v2686_v13 = vld [vmem:[%s3513_s2 + $0x324] ss:$8 sps:$4 sm:$0xff]  }
  0x74   : > { %911 = vmatprep.subr.bf16.mxu0 %v2614_v14  ;;  %974 = vmatprep.subr.bf16.mxu1 %v2614_v14  ;;  %v2684_v14 = vld [vmem:[%s3513_s2 + $0x320] ss:$8 sps:$4 sm:$0xff]  }
  0x77   : > { %912 = vmatpush1.bf16.msra.mxu0 %v2612_v15  ;;  %975 = vmatpush1.bf16.msra.mxu1 %v2612_v15  ;;  %v2689_v15 = vld [vmem:[%s3513_s2 + $0x334] ss:$8 sps:$4 sm:$0xff]  }
  0x78   : > { %913 = vmatprep.subr.bf16.mxu0 %v2617_v16  ;;  %976 = vmatprep.subr.bf16.mxu1 %v2617_v16  ;;  %v2687_v16 = vld [vmem:[%s3513_s2 + $0x330] ss:$8 sps:$4 sm:$0xff]  }
  0x7b   : > { %914 = vmatpush1.bf16.msra.mxu0 %v2615_v17  ;;  %977 = vmatpush1.bf16.msra.mxu1 %v2615_v17  ;;  %v2692_v17 = vld [vmem:[%s3513_s2 + $0x344] ss:$8 sps:$4 sm:$0xff]  }
  0x7c   : > { %915 = vmatprep.subr.bf16.mxu0 %v2620_v18  ;;  %978 = vmatprep.subr.bf16.mxu1 %v2620_v18  ;;  %v2690_v18 = vld [vmem:[%s3513_s2 + $0x340] ss:$8 sps:$4 sm:$0xff]  }
  0x7f   : > { %916 = vmatpush1.bf16.msra.mxu0 %v2618_v19  ;;  %979 = vmatpush1.bf16.msra.mxu1 %v2618_v19  ;;  %v2695_v19 = vld [vmem:[%s3513_s2 + $0x354] ss:$8 sps:$4 sm:$0xff]  }
  0x80   : > { %917 = vmatprep.subr.bf16.mxu0 %v2623_v20  ;;  %980 = vmatprep.subr.bf16.mxu1 %v2623_v20  ;;  %v2693_v20 = vld [vmem:[%s3513_s2 + $0x350] ss:$8 sps:$4 sm:$0xff]  }
  0x83   : > { %918 = vmatpush1.bf16.msra.mxu0 %v2621_v21  ;;  %981 = vmatpush1.bf16.msra.mxu1 %v2621_v21  ;;  %v2698_v21 = vld [vmem:[%s3513_s2 + $0x364] ss:$8 sps:$4 sm:$0xff]  }
  0x84   : > { %919 = vmatprep.subr.bf16.mxu0 %v2626_v22  ;;  %982 = vmatprep.subr.bf16.mxu1 %v2626_v22  ;;  %v2696_v22 = vld [vmem:[%s3513_s2 + $0x360] ss:$8 sps:$4 sm:$0xff]  }
  0x87   : > { %920 = vmatpush1.bf16.msra.mxu0 %v2624_v23  ;;  %983 = vmatpush1.bf16.msra.mxu1 %v2624_v23  ;;  %v2701_v23 = vld [vmem:[%s3513_s2 + $0x374] ss:$8 sps:$4 sm:$0xff]  }
  0x88   : > { %921 = vmatprep.subr.bf16.mxu0 %v2629_v24  ;;  %984 = vmatprep.subr.bf16.mxu1 %v2629_v24  ;;  %v2699_v24 = vld [vmem:[%s3513_s2 + $0x370] ss:$8 sps:$4 sm:$0xff]  }
  0x8b   : > { %922 = vmatpush1.bf16.msra.mxu0 %v2627_v25  ;;  %985 = vmatpush1.bf16.msra.mxu1 %v2627_v25  ;;  %v2704_v25 = vld [vmem:[%s3513_s2 + $0x384] ss:$8 sps:$4 sm:$0xff]  }
  0x8c   : > { %923 = vmatprep.subr.bf16.mxu0 %v2632_v26  ;;  %986 = vmatprep.subr.bf16.mxu1 %v2632_v26  ;;  %v2702_v26 = vld [vmem:[%s3513_s2 + $0x380] ss:$8 sps:$4 sm:$0xff]  }
  0x8f   : > { %924 = vmatpush1.bf16.msra.mxu0 %v2630_v27  ;;  %987 = vmatpush1.bf16.msra.mxu1 %v2630_v27  ;;  %v2707_v27 = vld [vmem:[%s3513_s2 + $0x394] ss:$8 sps:$4 sm:$0xff]  }
  0x90   : > { %925 = vmatprep.subr.bf16.mxu0 %v2635_v29  ;;  %988 = vmatprep.subr.bf16.mxu1 %v2635_v29  ;;  %v2710_v29 = vld [vmem:[%s3513_s2 + $0x3a4] ss:$8 sps:$4 sm:$0xff]  }
  0x93   : > { %926 = vmatpush1.bf16.msra.mxu0 %v2633_v31  ;;  %989 = vmatpush1.bf16.msra.mxu1 %v2633_v31  ;;  %v1281_v31 = vld [vmem:[%s2928_s16] sm:$0x3c]  ;;  %s2746_s16 = scalar_lea.vmem %s3471_s19, 16 }
  0x94   : > { %927 = vmatprep.subr.bf16.mxu0 %v2638_v32  ;;  %990 = vmatprep.subr.bf16.mxu1 %v2638_v32  ;;  %v2713_v32 = vld [vmem:[%s3513_s2 + $0x3b4] ss:$8 sps:$4 sm:$0xff]   ;;  %v1446_v33 = vpack.c.bf16 %v1281_v31, %v1281_v31  ;;  %p2747_p11 = scmp.ne.s32.totalorder %s3471_s19, %s2746_s16  ;;  %p2754_p1 = scmp.lt.s32.totalorder %s2752_s18, %s2746_s16 }
  0x96   : > { %p2748_p12 = pnand %p2747_p11, %p2886_p5  ;;  %p2755_p2 = por %p2754_p1, %p2753_p0 }
  0x97   : > { %928 = vmatpush1.bf16.msra.mxu0 %v2636_v34  ;;  %991 = vmatpush1.bf16.msra.mxu1 %v2636_v34  ;;  %v2711_v34 = vld [vmem:[%s3513_s2 + $0x3b0] ss:$8 sps:$4 sm:$0xff]  }
  0x98   : > { %929 = vmatprep.subr.bf16.mxu0 %v2641_v35  ;;  %992 = vmatprep.subr.bf16.mxu1 %v2641_v35  ;;  %v1450_v35 = vrot.slane %v1446_v33, 1  ;;  %p2749_p13 = pneg %p2748_p12 }
  0x9a   : > { %p2756_p3 = pnand %p2755_p2, %p2749_p13 }
  0x9b   : > { %930 = vmatpush1.bf16.msra.mxu0 %v2639_v39  ;;  %993 = vmatpush1.bf16.msra.mxu1 %v2639_v39  ;;  %v2716_v39 = vld [vmem:[%s3515_s4 + $0x8] sm:$0xff]  }
  0x9c   : > { %1160 = vmatprep.subr.bf16.mxu0 %v2644_v41  ;;  %1213 = vmatprep.subr.bf16.mxu1 %v2644_v41  ;;  %v2717_v41 = vld [vmem:[%s3515_s4 + $0x48] sm:$0xff]  }
  0x9e   : > { %940 = vmatmul.mubr.bf16.vlgmr.msra.gmra.mrb[0].mxu0 %v2997_v40  ;;  %1003 = vmatmul.mubr.bf16.vlgmr.msra.gmra.mrb[0].mxu1 %v3160_v43  ;;  %v2648_v40 = vld [vmem:[%s3513_s2 + $0x260] ss:$8 sps:$4 sm:$0xff]  }
  0x9f   : > { %1161 = vmatpush1.bf16.msra.mxu0 %v2642_v44  ;;  %1214 = vmatpush1.bf16.msra.mxu1 %v2642_v44  ;;  %v2720_v44 = vld [vmem:[%s3515_s4 + $0x18] sm:$0xff]  }
  0xa0   : > { %1162 = vmatprep.subr.bf16.mxu0 %v2647_v45  ;;  %1215 = vmatprep.subr.bf16.mxu1 %v2647_v45  ;;  %v2721_v45 = vld [vmem:[%s3515_s4 + $0x58] sm:$0xff]  }
  0xa1   : > { %2207 = vmatprep.mubr.msk.bf16.mxu0 %vm449_vm0, %v3085_v12  ;;  %2208 = vmatprep.mubr.msk.bf16.mxu1 %vm449_vm0, %v3168_v46  ;;  %v2681_v12 = vld [vmem:[%s3513_s2 + $0x310] ss:$8 sps:$4 sm:$0xff]  }
  0xa3   : > { %1163 = vmatpush1.bf16.msra.mxu0 %v2645_v47  ;;  %1216 = vmatpush1.bf16.msra.mxu1 %v2645_v47  ;;  %v2723_v47 = vld [vmem:[%s3515_s4 + $0x60] sm:$0xff]  }
  0xa4   : > { %1164 = vmatprep.subr.bf16.mxu0 %v2650_v48  ;;  %1217 = vmatprep.subr.bf16.mxu1 %v2650_v48  ;;  %v2724_v48 = vld [vmem:[%s3515_s4 + $0x28] sm:$0xff]  }
  0xa7   : > { %1165 = vmatpush1.bf16.msra.mxu0 %v2648_v40  ;;  %1218 = vmatpush1.bf16.msra.mxu1 %v2648_v40  ;;  %v2725_v40 = vld [vmem:[%s3515_s4 + $0x68] sm:$0xff]  }
  0xa8   : > { %1166 = vmatprep.subr.bf16.mxu0 %v2653_v49  ;;  %1219 = vmatprep.subr.bf16.mxu1 %v2653_v49  ;;  %v2726_v49 = vld [vmem:[%s3515_s4 + $0x30] sm:$0xff]  }
  0xab   : > { %1167 = vmatpush1.bf16.msra.mxu0 %v2651_v50  ;;  %1220 = vmatpush1.bf16.msra.mxu1 %v2651_v50  ;;  %v2727_v50 = vld [vmem:[%s3515_s4 + $0x70] sm:$0xff]  }
  0xac   : > { %1168 = vmatprep.subr.bf16.mxu0 %v2656_v51  ;;  %1221 = vmatprep.subr.bf16.mxu1 %v2656_v51  ;;  %v2728_v51 = vld [vmem:[%s3515_s4 + $0x38] sm:$0xff]  }
  0xaf   : > { %1169 = vmatpush1.bf16.msra.mxu0 %v2654_v52  ;;  %1222 = vmatpush1.bf16.msra.mxu1 %v2654_v52  ;;  %v2729_v52 = vld [vmem:[%s3515_s4 + $0x78] sm:$0xff]  }
  0xb0   : > { %1170 = vmatprep.subr.bf16.mxu0 %v2659_v53  ;;  %1223 = vmatprep.subr.bf16.mxu1 %v2659_v53 }
  0xb3   : > { %1171 = vmatpush1.bf16.msra.mxu0 %v2657_v54  ;;  %1224 = vmatpush1.bf16.msra.mxu1 %v2657_v54 }
  0xb4   : > { %1172 = vmatprep.subr.bf16.mxu0 %v2662_v55  ;;  %1225 = vmatprep.subr.bf16.mxu1 %v2662_v55 }
  0xb7   : > { %1173 = vmatpush1.bf16.msra.mxu0 %v2660_v56  ;;  %1226 = vmatpush1.bf16.msra.mxu1 %v2660_v56 }
  0xb8   : > { %1174 = vmatprep.subr.bf16.mxu0 %v2665_v57  ;;  %1227 = vmatprep.subr.bf16.mxu1 %v2665_v57 }
  0xbb   : > { %1175 = vmatpush1.bf16.msra.mxu0 %v2663_v58  ;;  %1228 = vmatpush1.bf16.msra.mxu1 %v2663_v58 }
  0xbc   : > { %1176 = vmatprep.subr.bf16.mxu0 %v2668_v59  ;;  %1229 = vmatprep.subr.bf16.mxu1 %v2668_v59 }
  0xbf   : > { %1177 = vmatpush1.bf16.msra.mxu0 %v2666_v60  ;;  %1230 = vmatpush1.bf16.msra.mxu1 %v2666_v60 }
  0xc0   : > { %1178 = vmatprep.subr.bf16.mxu0 %v2671_v61  ;;  %1231 = vmatprep.subr.bf16.mxu1 %v2671_v61  ;;  %v2259_v61 = vld [vmem:[%s3514_s3] ss:$0 sm:$0xff] }
  0xc3   : > { %1179 = vmatpush1.bf16.msra.mxu0 %v2669_v62  ;;  %1232 = vmatpush1.bf16.msra.mxu1 %v2669_v62 }
  0xc4   : > { %1180 = vmatprep.subr.bf16.mxu0 %v2674_v63  ;;  %1233 = vmatprep.subr.bf16.mxu1 %v2674_v63 }
  0xc7   : > { %1181 = vmatpush1.bf16.msra.mxu0 %v2672_v0  ;;  %1234 = vmatpush1.bf16.msra.mxu1 %v2672_v0 }
  0xc8   : > { %1182 = vmatprep.subr.bf16.mxu0 %v2677_v2  ;;  %1235 = vmatprep.subr.bf16.mxu1 %v2677_v2 }
  0xcb   : > { %1183 = vmatpush1.bf16.msra.mxu0 %v2675_v5  ;;  %1236 = vmatpush1.bf16.msra.mxu1 %v2675_v5  ;;  %v2731_v5 = vld [vmem:[%s3515_s4 + $0x80] sm:$0xff]  }
  0xcc   : > { %1403 = vmatprep.subr.bf16.mxu0 %v2680_v6  ;;  %1456 = vmatprep.subr.bf16.mxu1 %v2680_v6 }
  0xce   : > { %1193 = vmatmul.mubr.bf16.vlgmr.msra.gmra.mrb[0].mxu0 %v3160_v43  ;;  %1246 = vmatmul.mubr.bf16.vlgmr.msra.gmra.mrb[0].mxu1 %v3244_v8  ;;  %v2719_v43 = vld [vmem:[%s3515_s4 + $0x50] sm:$0xff]  }
  0xcf   : > { %1404 = vmatpush1.bf16.msra.mxu0 %v2678_v9  ;;  %1457 = vmatpush1.bf16.msra.mxu1 %v2678_v9  ;;  %v2734_v9 = vld [vmem:[%s3515_s4 + $0xd0] sm:$0xff]  }
  0xd0   : > { %1405 = vmatprep.subr.bf16.mxu0 %v2683_v10  ;;  %1458 = vmatprep.subr.bf16.mxu1 %v2683_v10  ;;  %v2735_v10 = vld [vmem:[%s3515_s4 + $0x90] sm:$0xff]  }
  0xd1   : > { %2257 = vmatprep.mubr.msk.bf16.mxu0 %vm449_vm0, %v3168_v46  ;;  %2258 = vmatprep.mubr.msk.bf16.mxu1 %vm449_vm0, %v1451_v11  ;;  %v2722_v46 = vld [vmem:[%s3515_s4 + $0x20] sm:$0xff]   ;;  %v2736_v11 = vld [vmem:[%s3515_s4 + $0xd8] sm:$0xff]  }
  0xd3   : > { %1406 = vmatpush1.bf16.msra.mxu0 %v2681_v12  ;;  %1459 = vmatpush1.bf16.msra.mxu1 %v2681_v12  ;;  %v2737_v12 = vld [vmem:[%s3515_s4 + $0x98] sm:$0xff]  }
  0xd4   : > { %1407 = vmatprep.subr.bf16.mxu0 %v2686_v13  ;;  %1460 = vmatprep.subr.bf16.mxu1 %v2686_v13  ;;  %v2738_v13 = vld [vmem:[%s3515_s4 + $0xe0] sm:$0xff]  }
  0xd7   : > { %1408 = vmatpush1.bf16.msra.mxu0 %v2684_v14  ;;  %1461 = vmatpush1.bf16.msra.mxu1 %v2684_v14  ;;  %v2739_v14 = vld [vmem:[%s3515_s4 + $0xa0] sm:$0xff]  }
  0xd8   : > { %1409 = vmatprep.subr.bf16.mxu0 %v2689_v15  ;;  %1462 = vmatprep.subr.bf16.mxu1 %v2689_v15  ;;  %v2740_v15 = vld [vmem:[%s3515_s4 + $0xe8] sm:$0xff]  }
  0xdb   : > { %1410 = vmatpush1.bf16.msra.mxu0 %v2687_v16  ;;  %1463 = vmatpush1.bf16.msra.mxu1 %v2687_v16  ;;  %v2741_v16 = vld [vmem:[%s3515_s4 + $0xa8] sm:$0xff]  }
  0xdc   : > { %1411 = vmatprep.subr.bf16.mxu0 %v2692_v17  ;;  %1464 = vmatprep.subr.bf16.mxu1 %v2692_v17  ;;  %v2742_v17 = vld [vmem:[%s3515_s4 + $0xf0] sm:$0xff]  }
  0xdf   : > { %1412 = vmatpush1.bf16.msra.mxu0 %v2690_v18  ;;  %1465 = vmatpush1.bf16.msra.mxu1 %v2690_v18  ;;  %v2743_v18 = vld [vmem:[%s3515_s4 + $0xb0] sm:$0xff]  }
  0xe0   : > { %1413 = vmatprep.subr.bf16.mxu0 %v2695_v19  ;;  %1466 = vmatprep.subr.bf16.mxu1 %v2695_v19  ;;  %v2744_v19 = vld [vmem:[%s3515_s4 + $0xf8] sm:$0xff]  }
  0xe3   : > { %1414 = vmatpush1.bf16.msra.mxu0 %v2693_v20  ;;  %1467 = vmatpush1.bf16.msra.mxu1 %v2693_v20  ;;  %v2745_v20 = vld [vmem:[%s3515_s4 + $0xb8] sm:$0xff]  }
  0xe4   : > { %1415 = vmatprep.subr.bf16.mxu0 %v2698_v21  ;;  %1468 = vmatprep.subr.bf16.mxu1 %v2698_v21 }
  0xe7   : > { %1416 = vmatpush1.bf16.msra.mxu0 %v2696_v22  ;;  %1469 = vmatpush1.bf16.msra.mxu1 %v2696_v22 }
  0xe8   : > { %1417 = vmatprep.subr.bf16.mxu0 %v2701_v23  ;;  %1470 = vmatprep.subr.bf16.mxu1 %v2701_v23 }
  0xeb   : > { %1418 = vmatpush1.bf16.msra.mxu0 %v2699_v24  ;;  %1471 = vmatpush1.bf16.msra.mxu1 %v2699_v24 }
  0xec   : > { %1419 = vmatprep.subr.bf16.mxu0 %v2704_v25  ;;  %1472 = vmatprep.subr.bf16.mxu1 %v2704_v25 }
  0xef   : > { %1420 = vmatpush1.bf16.msra.mxu0 %v2702_v26  ;;  %1473 = vmatpush1.bf16.msra.mxu1 %v2702_v26 }
  0xf0   : > { %1421 = vmatprep.subr.bf16.mxu0 %v2707_v27  ;;  %1474 = vmatprep.subr.bf16.mxu1 %v2707_v27 }
  0xf3   : > { %1422 = vmatpush1.bf16.msra.mxu0 %v2705_v28  ;;  %1475 = vmatpush1.bf16.msra.mxu1 %v2705_v28 }
  0xf4   : > { %1423 = vmatprep.subr.bf16.mxu0 %v2710_v29  ;;  %1476 = vmatprep.subr.bf16.mxu1 %v2710_v29 }
  0xf7   : > { %1424 = vmatpush1.bf16.msra.mxu0 %v2708_v30  ;;  %1477 = vmatpush1.bf16.msra.mxu1 %v2708_v30 }
  0xf8   : > { %1425 = vmatprep.subr.bf16.mxu0 %v2713_v32  ;;  %1478 = vmatprep.subr.bf16.mxu1 %v2713_v32 }
  0xfb   : > { %1426 = vmatpush1.bf16.msra.mxu0 %v2711_v34  ;;  %1479 = vmatpush1.bf16.msra.mxu1 %v2711_v34 }
  0xfc   : > { %2401 = vmatprep.subr.bf16.mxu1 %v2810_v38  ;;  %2381 = vmatprep.subr.bf16.mxu0 %v2810_v38 }
  0xfe   : > { %1436 = vmatmul.mubr.bf16.vlgmr.msra.gmra.mrb[0].mxu0 %v3244_v8  ;;  %1489 = vmatmul.mubr.bf16.vlgmr.msra.gmra.mrb[0].mxu1 %v1450_v35  ;;  %v2733_v8 = vld [vmem:[%s3515_s4 + $0x88] sm:$0xff]  }
  0xff   : > { %2402 = vmatpush3.bf16.msra.mxu1 %v2714_v36  ;;  %2382 = vmatpush3.bf16.msra.mxu0 %v2715_v37 }
 0x100   : > { %2403 = vmatprep.subr.bf16.mxu1 %v2810_v38  ;;  %2383 = vmatprep.subr.bf16.mxu0 %v2810_v38 }
 0x101   : > { %2417 = vmatprep.mubr.msk.bf16.mxu1 %vm2811_vm1, %v2810_v38  ;;  %2397 = vmatprep.mubr.msk.bf16.mxu0 %vm2811_vm1, %v2810_v38 }
 0x103   : > { %2404 = vmatpush3.bf16.msra.mxu1 %v2716_v39  ;;  %2384 = vmatpush3.bf16.msra.mxu0 %v2717_v41  ;;  %v1942_v39 = vld [vmem:[%s3516_s5] sm:$0x1] }
 0x104   : > { %2405 = vmatprep.subr.bf16.mxu1 %v2810_v38  ;;  %2385 = vmatprep.subr.bf16.mxu0 %v2810_v38 }
 0x107   : > { %2406 = vmatpush3.bf16.msra.mxu1 %v2718_v42  ;;  %2386 = vmatpush3.bf16.msra.mxu0 %v2719_v43 }
 0x108   : > { %2407 = vmatprep.subr.bf16.mxu1 %v2810_v38  ;;  %2387 = vmatprep.subr.bf16.mxu0 %v2810_v38 }
 0x10b   : > { %2408 = vmatpush3.bf16.msra.mxu1 %v2720_v44  ;;  %2388 = vmatpush3.bf16.msra.mxu0 %v2721_v45 }
 0x10c   : > { %2409 = vmatprep.subr.bf16.mxu1 %v2810_v38  ;;  %2389 = vmatprep.subr.bf16.mxu0 %v2810_v38 }
 0x10f   : > { %2410 = vmatpush3.bf16.msra.mxu1 %v2722_v46  ;;  %2390 = vmatpush3.bf16.msra.mxu0 %v2723_v47 }
 0x110   : > { %2411 = vmatprep.subr.bf16.mxu1 %v2810_v38  ;;  %2391 = vmatprep.subr.bf16.mxu0 %v2810_v38 }
 0x113   : > { %2412 = vmatpush3.bf16.msra.mxu1 %v2724_v48  ;;  %2392 = vmatpush3.bf16.msra.mxu0 %v2725_v40 }
 0x114   : > { %2413 = vmatprep.subr.bf16.mxu1 %v2810_v38  ;;  %2393 = vmatprep.subr.bf16.mxu0 %v2810_v38 }
 0x117   : > { %2414 = vmatpush3.bf16.msra.mxu1 %v2726_v49  ;;  %2394 = vmatpush3.bf16.msra.mxu0 %v2727_v50 }
 0x118   : > { %2415 = vmatprep.subr.bf16.mxu1 %v2810_v38  ;;  %2395 = vmatprep.subr.bf16.mxu0 %v2810_v38 }
 0x11b   : > { %2416 = vmatpush3.bf16.msra.mxu1 %v2728_v51  ;;  %2396 = vmatpush3.bf16.msra.mxu0 %v2729_v52 }
 0x11c   : > { %2441 = vmatprep.subr.bf16.mxu1 %v2810_v38  ;;  %2421 = vmatprep.subr.bf16.mxu0 %v2810_v38 }
 0x1d1   : > { %v1437_v53 = vpop.f32.mrb[0].mxu0  ;;  %v1490_v54 = vpop.f32.mrb[0].mxu1 }
 0x1d2   : > { %v1499_v55 = vmax.f32 %v1437_v53, %v1490_v54  ;;  %v1439_v56 = vpop.f32.mrb[1].mxu0  ;;  %v1492_v57 = vpop.f32.mrb[1].mxu1 }
 0x1d3   : > { %v1500_v58 = vmax.f32 %v1439_v56, %v1492_v57  ;;  %v1441_v59 = vpop.f32.mrb[2].mxu0  ;;  %v1494_v60 = vpop.f32.mrb[2].mxu1 }
 0x1d4   : > { %v1442_v62 = vpop.f32.mrb[3].mxu0  ;;  %v1495_v63 = vpop.f32.mrb[3].mxu1 }
 0x1d5   : > { %v1501_v0 = vmax.f32 %v1499_v55, %v1500_v58 }
 0x1d7   : > { %v1509_v1 = vadd.f32 %v2259_v61, %v1501_v0 }
 0x1d9   : > { %v1510_v2 = vmax.f32 %v1509_v1, 0.0 }
 0x1db   : > { %v1511_v4 = vpack.c.bf16 %v1510_v2, %v1510_v2 }
 0x1dd   : > { %2418 = vmatmul.mubr.bf16.vlgmr.msra.gmra.mrb[4].mxu1 %v1511_v4  ;;  %v1546_v6 = vshrl.u32 %v1511_v4, 16  ;;  %v1743_v22 = vrot.slane %v1511_v4, 1 }
 0x1de   : > { %2442 = vmatpush3.bf16.msra.mxu1 %v2730_v3  ;;  %2457 = vmatprep.mubr.msk.bf16.mxu1 %vm2811_vm1, %v2810_v38 }
 0x1df   : > { %2398 = vmatmul.mubr.bf16.vlgmr.msra.gmra.mrb[4].mxu0 %v1546_v6  ;;  %2443 = vmatprep.subr.bf16.mxu1 %v2810_v38  ;;  %v1851_v21 = vrot.slane %v1546_v6, 1 }
 0x1e0   : > { %2422 = vmatpush3.bf16.msra.mxu0 %v2731_v5  ;;  %2437 = vmatprep.mubr.msk.bf16.mxu0 %vm2811_vm1, %v2810_v38 }
 0x1e1   : > { %2423 = vmatprep.subr.bf16.mxu0 %v2810_v38 }
 0x1e2   : > { %2444 = vmatpush3.bf16.msra.mxu1 %v2732_v7 }
 0x1e3   : > { %2445 = vmatprep.subr.bf16.mxu1 %v2810_v38 }
 0x1e4   : > { %2424 = vmatpush3.bf16.msra.mxu0 %v2733_v8 }
 0x1e5   : > { %2425 = vmatprep.subr.bf16.mxu0 %v2810_v38 }
 0x1e6   : > { %2446 = vmatpush3.bf16.msra.mxu1 %v2734_v9 }
 0x1e7   : > { %2447 = vmatprep.subr.bf16.mxu1 %v2810_v38 }
 0x1e8   : > { %2426 = vmatpush3.bf16.msra.mxu0 %v2735_v10 }
 0x1e9   : > { %2427 = vmatprep.subr.bf16.mxu0 %v2810_v38 }
 0x1ea   : > { %2448 = vmatpush3.bf16.msra.mxu1 %v2736_v11 }
 0x1eb   : > { %2449 = vmatprep.subr.bf16.mxu1 %v2810_v38 }
 0x1ec   : > { %2428 = vmatpush3.bf16.msra.mxu0 %v2737_v12 }
 0x1ed   : > { %2429 = vmatprep.subr.bf16.mxu0 %v2810_v38 }
 0x1ee   : > { %2450 = vmatpush3.bf16.msra.mxu1 %v2738_v13 }
 0x1ef   : > { %2451 = vmatprep.subr.bf16.mxu1 %v2810_v38 }
 0x1f0   : > { %2430 = vmatpush3.bf16.msra.mxu0 %v2739_v14 }
 0x1f1   : > { %2431 = vmatprep.subr.bf16.mxu0 %v2810_v38 }
 0x1f2   : > { %2452 = vmatpush3.bf16.msra.mxu1 %v2740_v15 }
 0x1f3   : > { %2453 = vmatprep.subr.bf16.mxu1 %v2810_v38 }
 0x1f4   : > { %2432 = vmatpush3.bf16.msra.mxu0 %v2741_v16 }
 0x1f5   : > { %2433 = vmatprep.subr.bf16.mxu0 %v2810_v38 }
 0x1f6   : > { %2454 = vmatpush3.bf16.msra.mxu1 %v2742_v17 }
 0x1f7   : > { %2455 = vmatprep.subr.bf16.mxu1 %v2810_v38 }
 0x1f8   : > { %2434 = vmatpush3.bf16.msra.mxu0 %v2743_v18 }
 0x1f9   : > { %2435 = vmatprep.subr.bf16.mxu0 %v2810_v38 }
 0x1fa   : > { %2456 = vmatpush3.bf16.msra.mxu1 %v2744_v19 }
 0x1fc   : > { %2436 = vmatpush3.bf16.msra.mxu0 %v2745_v20 }
 0x1fd   : > { %2458 = vmatmul.mubr.bf16.vlgmr.msra.gmra.mrb[8].mxu1 %v1851_v21 }
 0x1ff   : > { %2438 = vmatmul.mubr.bf16.vlgmr.msra.gmra.mrb[8].mxu0 %v1743_v22 }
 0x2b0   : > { %v1719_v23 = vpop.f32.mrb[4].mxu1 }
 0x2b1   : > { %v2419_v24 = vpop.f32.mrb[5].mxu1 }
 0x2b2   : > { %v1631_v25 = vpop.f32.mrb[4].mxu0  ;;  %v1722_v26 = vpop.f32.mrb[6].mxu1 }
 0x2b3   : > { %v1720_v27 = vadd.f32 %v1719_v23, %v1631_v25  ;;  %v2399_v28 = vpop.f32.mrb[5].mxu0  ;;  %v2420_v29 = vpop.f32.mrb[7].mxu1 }
 0x2b4   : > { %v1634_v30 = vpop.f32.mrb[6].mxu0 }
 0x2b5   : > { %v2400_v31 = vpop.f32.mrb[7].mxu0 }
 0x2d0   : > { %v1935_v32 = vpop.f32.mrb[8].mxu1 }
 0x2d1   : > { %v2459_v33 = vpop.f32.mrb[9].mxu1 }
 0x2d2   : > { %v1827_v34 = vpop.f32.mrb[8].mxu0  ;;  %v1938_v35 = vpop.f32.mrb[10].mxu1 }
 0x2d3   : > { %v1833_v36 = vadd.f32 %v1827_v34, %v1720_v27  ;;  %v2439_v37 = vpop.f32.mrb[9].mxu0  ;;  %v2460_v38 = vpop.f32.mrb[11].mxu1 }
 0x2d4   : > { %v1830_v41 = vpop.f32.mrb[10].mxu0 }
 0x2d5   : > { %v1941_v42 = vadd.f32 %v1935_v32, %v1833_v36  ;;  %v2440_v43 = vpop.f32.mrb[11].mxu0 }
 0x2d7   : > { %v1943_v44 = vadd.f32 %v1942_v39, %v1941_v42 }
 0x2d9   : > { %1944 = vst [vmem:[%s258_s11] sm:$0x1] %v1943_v44 }
 0x2da   : > { %2759 = shalt.err (!%p2756_p3)
}
 0x2db   : > { %s2760_s20 = scalar_lea.hbm %s3469_s14, 16  ;;  %s2764_s29 = scalar_lea.hbm %s3517_s6, 32 }
 0x2dc   : > { %p2761_p4 = scmp.ne.s32.totalorder %s3469_s14, %s2760_s20  ;;  %p2765_p9 = scmp.lt.u32.totalorder %s3469_s14, %s3517_s6 }
 0x2dd   : > { %p2766_p10 = scmp.lt.u32.totalorder %s2764_s29, %s2760_s20  ;;  %p2768_p12 = scmp.lt.u32.totalorder %s2760_s20, %s3469_s14 }
 0x2de   : > { %p2762_p7 = pnand %p2761_p4, %p2886_p5 }
 0x2df   : > { %p2767_p11 = por %p2766_p10, %p2765_p9 }
 0x2e0   : > { %p2763_p8 = pneg %p2762_p7 }
 0x2e1   : > { %p2769_p13 = por %p2768_p12, %p2767_p11 }
 0x2e3   : > { %p2770_p0 = pnand %p2769_p13, %p2763_p8 }
 0x2e5   : > { %2773 = shalt.err (!%p2770_p0)
}
 0x2e6   : > { %2493 = dma.vmem_to_hbm [thread:$0]  (%p2886_p5), %s3471_s19, 16, %s3469_s14, %s1946_s15  }
 0x2e7 PF: > { %p2499_p1 = scmp.ge.s32.totalorder %s2808_s24, 2  ;;  %s1970_s11 = sand.u32 1, %s2796_s21  }
 0x2e8   : > { %s1971_s12 = scalar_lea.sflag [#allocation3], %s1970_s11 }
 0x2e9   : > { %p2496_p2 = pnand %p2499_p1, %p2890_p6 }
 0x2eb   : > { %2791 = dma.done.wait (!%p2496_p2), %s1971_s12, 16  }
 0x2ec   : > { %2793 = vsyncadd (!%p2496_p2), %s1971_s12, 4294967280  ;;  %p16_p3 = scmp.ge.s32.totalorder %s2873_s27, 4   ;;  %s3520_s21 = smov %s2800_s22 }
 0x2ed   : > { %s3521_s22 = smov %s2804_s23  ;;  %s3522_s23 = smov %s2884_s30 }
 0x2ee   : > { %s3523_s24 = smov %s2873_s27  ;;  %18 = sbr.rel (!%p16_p3) target bundleno = 3 (0x3), region = 89 }
 0x2f5   :  { %1975 = vsyncpa [#allocation3], 1 }
 0x2f6   :  { %1977 = vsyncpa [#allocation3 + $0x1], 1 }

</bundles_post_ra>
